<compile_context>
chip_gen: v6e
topology: v6e:2x2x1
jax: 0.10.0
libtpu: 0.0.40
codegen_flags: <defaults>
</compile_context>

<pallas_src>
import math
from functools import partial

import jax
import jax.numpy as jnp
from jax.experimental import pallas as pl
from jax.experimental.pallas import tpu as pltpu


# --------------------------------------------------------------------------
# numerics helpers (safe to lower inside Pallas)
# --------------------------------------------------------------------------
def _softplus(x):
    return jnp.log1p(jnp.exp(-jnp.abs(x))) + jnp.maximum(x, 0.0)


def _sigmoid(x):
    return 1.0 / (1.0 + jnp.exp(-x))


# --------------------------------------------------------------------------
# Pallas kernel 1: Euler-Maruyama SDE integration with logqp (single grid step)
#
#   fused activation layouts:
#     act1 = softplus(y @ W1 + ctx_add[step])        -> [h1 | g1 | f1]   (B, 3H)
#     act2 = softplus(act1 @ W2 + b2)                -> [h2 | f2]        (B, 2H)
#     a3   = act2 @ W3 + b3                          -> [h_out | f_out]  (B, 2L)
#     g_out = sigmoid(g1 @ Wg2 + bg2)                                    (B, L)
#   W2 / W3 are block-diagonal so the fused matmuls reproduce the separate nets.
# --------------------------------------------------------------------------
def sde_kernel(z0_ref, ctx_ref, eps_ref, km_ref, slab_ref,
               zs_ref, logqp_ref, *, N, S, dt, offs, L, H):
    H2, H3, L2 = 2 * H, 3 * H, 2 * L

    # hoisted weight reads: one VMEM load each, live across the whole loop
    W1 = slab_ref[offs['W1']:offs['W1'] + L, 0:H3]       # (L, 3H)
    W2 = slab_ref[offs['W2']:offs['W2'] + H3, 0:H2]      # (3H, 2H) block-diag
    b2 = slab_ref[offs['b2']:offs['b2'] + 1, 0:H2]       # (1, 2H)
    W3 = slab_ref[offs['W3']:offs['W3'] + H2, 0:L2]      # (2H, 2L) block-diag
    b3 = slab_ref[offs['b3']:offs['b3'] + 1, 0:L2]       # (1, 2L)
    Wg2 = slab_ref[offs['Wg2']:offs['Wg2'] + H, 0:L]     # (H, L)
    bg2 = slab_ref[offs['bg2']:offs['bg2'] + 1, 0:L]     # (1, L)

    sqrt_dt = math.sqrt(dt)
    half_dt = 0.5 * dt

    def interval(n, carry):
        y, logqp = carry
        for s in range(S):                                # static unroll (S small)
            g = n * S + s
            a1 = jnp.dot(y, W1, preferred_element_type=jnp.float32) + ctx_ref[g]
            act1 = _softplus(a1)                          # [h1 | g1 | f1]
            act2 = _softplus(jnp.dot(act1, W2, preferred_element_type=jnp.float32) + b2)
            a3 = jnp.dot(act2, W3, preferred_element_type=jnp.float32) + b3
            h_out = a3[:, 0:L]
            f_out = a3[:, L:L2]
            g1 = act1[:, H:H2]
            g_out = _sigmoid(jnp.dot(g1, Wg2, preferred_element_type=jnp.float32) + bg2)

            # km = 0 where ctx[i] was all-NaN (prior drift, zero logqp increment)
            km = km_ref[g]                                # (B, L), values in {0, 1}
            diff = km * (f_out - h_out)
            u = diff * pl.reciprocal(g_out, approx=True)
            logqp = logqp + half_dt * jnp.sum(u * u, axis=1, keepdims=True)

            # Euler-Maruyama update, dW = sqrt(dt) * eps
            y = y + (h_out + diff) * dt + g_out * (sqrt_dt * eps_ref[g])

        zs_ref[n] = y                                     # write once per interval
        return y, logqp

    y0 = z0_ref[...]
    logqp0 = jnp.zeros((y0.shape[0], 1), jnp.float32)
    _, logqp_fin = jax.lax.fori_loop(0, N, interval, (y0, logqp0))
    logqp_ref[...] = logqp_fin                            # single write at the end


def sde_integrate(z0, ctx_add, eps, km, slab, *, N, S, dt, offs, L, H):
    B = z0.shape[0]

    def fs(shape):
        nd = len(shape)
        return pl.BlockSpec(shape, lambda i, nd=nd: (0,) * nd)

    kern = partial(sde_kernel, N=N, S=S, dt=float(dt), offs=offs, L=L, H=H)
    return pl.pallas_call(
        kern,
        grid=(1,),
        in_specs=[fs(z0.shape), fs(ctx_add.shape), fs(eps.shape),
                  fs(km.shape), fs(slab.shape)],
        out_specs=(pl.BlockSpec((N, B, L), lambda i: (0, 0, 0)),
                   pl.BlockSpec((B, 1), lambda i: (0, 0))),
        out_shape=(jax.ShapeDtypeStruct((N, B, L), jnp.float32),
                   jax.ShapeDtypeStruct((B, 1), jnp.float32)),
        compiler_params=pltpu.CompilerParams(dimension_semantics=("arbitrary",)),
    )(z0, ctx_add, eps, km, slab)


# --------------------------------------------------------------------------
# Pallas kernel 2: reconstruction log-likelihood, one fused grid step.
#   inputs flattened to (T*B, L); mu/logstd projectors fused into one (L, 2D)
#   matmul; per-row (time*batch) sums are written, scalar finish done outside.
# --------------------------------------------------------------------------
def loglik_kernel(z_ref, x_ref, wdec_ref, bdec_ref, out_ref, *, D):
    proj = jnp.dot(z_ref[...], wdec_ref[...],
                   preferred_element_type=jnp.float32) + bdec_ref[...]   # (R, 2D)
    mu = proj[:, 0:D]
    logstd = jnp.clip(proj[:, D:2 * D], -10.0, 2.0)
    d = (x_ref[...] - mu) * jnp.exp(-logstd)
    logp = -0.5 * d * d - logstd - 0.5 * math.log(2.0 * math.pi)
    out_ref[...] = jnp.sum(logp, axis=1, keepdims=True)


def decode_loglik(z_flat, x_flat, Wdec, bdec, D):
    R = z_flat.shape[0]

    def fs(shape):
        nd = len(shape)
        return pl.BlockSpec(shape, lambda i, nd=nd: (0,) * nd)

    kern = partial(loglik_kernel, D=D)
    return pl.pallas_call(
        kern,
        grid=(1,),
        in_specs=[fs(z_flat.shape), fs(x_flat.shape), fs(Wdec.shape), fs(bdec.shape)],
        out_specs=pl.BlockSpec((R, 1), lambda i: (0, 0)),
        out_shape=jax.ShapeDtypeStruct((R, 1), jnp.float32),
        compiler_params=pltpu.CompilerParams(dimension_semantics=("arbitrary",)),
    )(z_flat, x_flat, Wdec, bdec)


# --------------------------------------------------------------------------
# Host-side packing of the fused SDE-net weights into one (rows, 128) f32 slab.
# --------------------------------------------------------------------------
def pack_sde_params(params, L, H):
    H2, H3, L2 = 2 * H, 3 * H, 2 * L

    def pad8(n):
        return ((n + 7) // 8) * 8

    layout = (('W1', L), ('W2', H3), ('b2', 1), ('W3', H2), ('b3', 1),
              ('Wg2', H), ('bg2', 1))
    offs, off = {}, 0
    for name, r in layout:
        offs[name] = off
        off += pad8(r)

    W1 = jnp.concatenate([params['Wh1'], params['Wg1'], params['Wf1y']], axis=1)   # (L,3H)
    W2 = jnp.zeros((H3, H2), jnp.float32)
    W2 = W2.at[0:H, 0:H].set(params['Wh2']).at[2 * H:3 * H, H:2 * H].set(params['Wf2'])
    b2 = jnp.concatenate([params['bh2'], params['bf2']], axis=1)                   # (1,2H)
    W3 = jnp.zeros((H2, L2), jnp.float32)
    W3 = W3.at[0:H, 0:L].set(params['Wh3']).at[H:2 * H, L:2 * L].set(params['Wf3'])
    b3 = jnp.concatenate([params['bh3'], params['bf3']], axis=1)                   # (1,2L)

    pieces = {'W1': W1, 'W2': W2, 'b2': b2, 'W3': W3, 'b3': b3,
              'Wg2': params['Wg2'], 'bg2': params['bg2']}
    slab = jnp.zeros((off, 128), jnp.float32)
    for name, arr in pieces.items():
        r, c = arr.shape
        slab = slab.at[offs[name]:offs[name] + r, 0:c].set(arr)
    return slab, offs


# --------------------------------------------------------------------------
# Encoder (bidirectional 2-layer GRU) -- plain-JAX glue feeding the kernels
# TODO(synk): GRU recurrence kept in plain JAX (lax.scan); the SDE Euler loop
# and the decoder log-likelihood are the Pallas hot paths.
# --------------------------------------------------------------------------
def gru_cell(x, h, Wi, Wh, bi, bh):
    gi = x @ Wi + bi
    gh = h @ Wh + bh
    ir, iz, inn = jnp.split(gi, 3, axis=-1)
    hr, hz, hn = jnp.split(gh, 3, axis=-1)
    r = jax.nn.sigmoid(ir + hr)
    z = jax.nn.sigmoid(iz + hz)
    n = jnp.tanh(inn + r * hn)
    return (1.0 - z) * n + z * h


def run_gru_dir(x_seq, p):
    B = x_seq.shape[1]
    H = p['Wh'].shape[0]
    h0 = jnp.zeros((B, H), x_seq.dtype)

    def step(h, x):
        hn = gru_cell(x, h, p['Wi'], p['Wh'], p['bi'], p['bh'])
        return hn, hn

    hT, out = jax.lax.scan(step, h0, x_seq)
    return out, hT


def bigru(x_seq, layers):
    fin = []
    inp = x_seq
    for lp in layers:
        out_f, hf = run_gru_dir(inp, lp['fwd'])
        out_b_rev, hb = run_gru_dir(inp[::-1], lp['bwd'])
        inp = jnp.concatenate([out_f, out_b_rev[::-1]], axis=-1)
        fin.extend([hf, hb])
    return inp, jnp.stack(fin, axis=0)          # (T,B,2H), (2*layers,B,H)


def encoder_forward(params, inp):
    seq, fin = bigru(inp, params['gru'])
    B = inp.shape[1]
    fin_flat = jnp.transpose(fin, (1, 0, 2)).reshape(B, -1)
    qz0_params = fin_flat @ params['Wq'] + params['bq']       # (B, 2L)
    ctx = seq @ params['Wctx'] + params['bctx']               # (T, B, C)
    return ctx, qz0_params


# --------------------------------------------------------------------------
# Parameter construction (deterministic synthetic init)
# --------------------------------------------------------------------------
def init_params(key, D, L, C, H, O, num_gru_layers=2):
    keys = iter(jax.random.split(key, 64))

    def lin_init(fan_in, fan_out):
        bound = 1.0 / math.sqrt(fan_in)
        W = jax.random.uniform(next(keys), (fan_in, fan_out), jnp.float32, -bound, bound)
        b = jax.random.uniform(next(keys), (1, fan_out), jnp.float32, -bound, bound)
        return W, b

    p = {}
    gru_layers = []
    in_size = D
    for _ in range(num_gru_layers):
        layer = {}
        for d in ('fwd', 'bwd'):
            bound = 1.0 / math.sqrt(H)
            layer[d] = {
                'Wi': jax.random.uniform(next(keys), (in_size, 3 * H), jnp.float32, -bound, bound),
                'Wh': jax.random.uniform(next(keys), (H, 3 * H), jnp.float32, -bound, bound),
                'bi': jax.random.uniform(next(keys), (3 * H,), jnp.float32, -bound, bound),
                'bh': jax.random.uniform(next(keys), (3 * H,), jnp.float32, -bound, bound),
            }
        gru_layers.append(layer)
        in_size = 2 * H
    p['gru'] = gru_layers

    p['Wq'], p['bq'] = lin_init(2 * H * num_gru_layers, 2 * L)     # qz0_net
    p['Wctx'], p['bctx'] = lin_init(2 * H, C)                      # encoder.lin ('full')

    Wf1, p['bf1'] = lin_init(L + C, H)                             # f_net
    p['Wf1y'], p['Wf1c'] = Wf1[:L], Wf1[L:]
    p['Wf2'], p['bf2'] = lin_init(H, H)
    p['Wf3'], p['bf3'] = lin_init(H, L)

    p['Wh1'], p['bh1'] = lin_init(L, H)                            # h_net
    p['Wh2'], p['bh2'] = lin_init(H, H)
    p['Wh3'], p['bh3'] = lin_init(H, L)

    p['Wg1'], p['bg1'] = lin_init(L, H)                            # g_net
    p['Wg2'], p['bg2'] = lin_init(H, L)

    p['Wmu'], p['bmu'] = lin_init(L, D)                            # mu_projector
    p['Wls'], p['bls'] = lin_init(L, D)                            # logstd_projector
    p['Wo'], p['bo'] = lin_init(L, O)                              # output_projector

    p['pz0_mean'] = jnp.zeros((1, L), jnp.float32)
    p['pz0_logstd'] = jnp.zeros((1, L), jnp.float32)
    return p


# --------------------------------------------------------------------------
# LatentSDE.forward
# --------------------------------------------------------------------------
def latent_sde_forward(params, xs, ts_in, ts_out, key, dt=0.01, forecast_mode='prior'):
    T_in, B, D = xs.shape
    T_out = ts_out.shape[0]
    L = params['pz0_mean'].shape[1]
    C = params['Wctx'].shape[1]
    H = params['Wh1'].shape[1]

    # ---- encoder on time-reversed input, ctx flipped back (glue) ----
    ctx, qz0_params = encoder_forward(params, xs[::-1])
    ctx = ctx[::-1]
    n_extra = T_out - T_in
    if forecast_mode == 'prior':
        pad = jnp.full((n_extra, B, C), jnp.nan, jnp.float32)
    else:
        pad = jnp.broadcast_to(ctx[-1][None], (n_extra, B, C))
    ctx_ext = jnp.concatenate([ctx, pad], axis=0)

    qz0_mean, qz0_logstd = jnp.split(qz0_params, 2, axis=1)
    k_z0, k_bm = jax.random.split(key)
    z0 = qz0_mean + jnp.exp(qz0_logstd) * jax.random.normal(k_z0, qz0_mean.shape, jnp.float32)

    # ---- Euler step schedule (torchsde.sdeint fixed-dt grid; glue) ----
    N = T_out - 1
    spacing = float(ts_out[1] - ts_out[0])
    S = int(round(spacing / dt))                      # sub-steps per output interval
    NS = N * S
    t_steps = (ts_out[:-1, None] + dt * jnp.arange(S, dtype=jnp.float32)[None, :]).reshape(-1)
    idx = jnp.minimum(jnp.searchsorted(ts_in, t_steps, side='right'), T_in - 1)
    ctx_steps = ctx_ext[idx]                                          # (NS, B, C)
    nan_flags = jnp.all(jnp.isnan(ctx_steps), axis=(1, 2))
    ctx_steps = jnp.where(jnp.isnan(ctx_steps), 0.0, ctx_steps)       # NaNs masked
    km = jnp.broadcast_to((1.0 - nan_flags.astype(jnp.float32))[:, None, None], (NS, B, L))
    eps = jax.random.normal(k_bm, (NS, B, L), jnp.float32)            # Brownian increments

    # ---- hoist the y-independent half of f_net's first layer out of the
    #      recurrence: one batched matmul for all NS steps + fused layer-1 biases
    ctx_f = jnp.einsum('sbc,ch->sbh', ctx_steps, params['Wf1c']) + params['bf1'][None]
    bias_hg = jnp.concatenate([params['bh1'], params['bg1']], axis=1)            # (1, 2H)
    ctx_add = jnp.concatenate(
        [jnp.broadcast_to(bias_hg[None], (NS, B, 2 * H)), ctx_f], axis=-1)       # (NS,B,3H)

    # ---- pack fused f/h/g weights into one tile-aligned slab (single DMA) ----
    # At these sizes ctx_add/eps/km total ~1 MB, so keeping them whole-sequence
    # VMEM-resident is fine on every generation (would stream per-interval for
    # much larger B/L/horizons, esp. on v7x's 64 MiB VMEM).
    slab, offs = pack_sde_params(params, L, H)

    # ---- Pallas kernel 1: SDE integration + logqp (single invocation) ----
    zs_rest, logqp_acc = sde_integrate(z0, ctx_add, eps, km, slab,
                                       N=N, S=S, dt=dt, offs=offs, L=L, H=H)

    zs = jnp.concatenate([z0[None], zs_rest], axis=0)                  # (T_out, B, L)

    # ---- Pallas kernel 2: reconstruction log-likelihood (single fused step) ----
    Wdec = jnp.concatenate([params['Wmu'], params['Wls']], axis=1)     # (L, 2D)
    bdec = jnp.concatenate([params['bmu'], params['bls']], axis=1)     # (1, 2D)
    z_flat = zs[:T_in].reshape(T_in * B, L)
    x_flat = xs.reshape(T_in * B, D)
    per_row = decode_loglik(z_flat, x_flat, Wdec, bdec, D)             # (T_in*B, 1)
    log_pxs = jnp.sum(per_row) / B                                     # sum(0,2).mean(0)

    # ---- KL(q(z0) || p(z0)) (tiny, plain JAX) ----
    pm, plog = params['pz0_mean'], params['pz0_logstd']
    var_q = jnp.exp(2.0 * qz0_logstd)
    var_p = jnp.exp(2.0 * plog)
    kl = plog - qz0_logstd + (var_q + (qz0_mean - pm) ** 2) / (2.0 * var_p) - 0.5
    logqp0 = jnp.mean(jnp.sum(kl, axis=1))
    logqp_path = jnp.mean(logqp_acc[:, 0])

    # ---- output projection of forecast latents (tiny; plain JAX) ----
    output = jnp.einsum('tbl,lo->tbo', zs[T_in:], params['Wo']) + params['bo'][None]
    return output, log_pxs, logqp0 + logqp_path


# --------------------------------------------------------------------------
if __name__ == "__main__":
    D, L, C, H, O = 3, 4, 8, 32, 2          # data, latent, context, hidden, output sizes
    B, T_in, T_out = 4, 8, 12               # batch, observed steps, total steps
    dt = 0.01

    key = jax.random.PRNGKey(0)
    k_param, k_data, k_fwd = jax.random.split(key, 3)

    params = init_params(k_param, D, L, C, H, O)

    ts_out = jnp.arange(T_out, dtype=jnp.float32) * 0.08
    ts_in = ts_out[:T_in]
    xs = jax.random.normal(k_data, (T_in, B, D), jnp.float32)

    output, log_pxs, kl_total = latent_sde_forward(params, xs, ts_in, ts_out, k_fwd, dt=dt)
    jax.block_until_ready((output, log_pxs, kl_total))

    assert output.shape == (T_out - T_in, B, O)
    assert bool(jnp.isfinite(log_pxs)) and bool(jnp.isfinite(kl_total))
    print("KERNEL_OK")
</pallas_src>

<mosaic_0001>
module attributes {stable_mosaic.version = 11 : i64} {
  func.func @sde_kernel(%arg0: i32, %arg1: memref<4x4xf32, #tpu.memory_space<vmem>>, %arg2: memref<88x4x96xf32, #tpu.memory_space<vmem>>, %arg3: memref<88x4x4xf32, #tpu.memory_space<vmem>>, %arg4: memref<88x4x4xf32, #tpu.memory_space<vmem>>, %arg5: memref<224x128xf32, #tpu.memory_space<vmem>>, %arg6: memref<11x4x4xf32, #tpu.memory_space<vmem>>, %arg7: memref<4x1xf32, #tpu.memory_space<vmem>>) attributes {dimension_semantics = [#tpu.dimension_semantics<arbitrary>], iteration_bounds = array<i64: 1>, scalar_prefetch = 0 : i64, scratch_operands = 0 : i64, tpu.core_type = #tpu.core_type<tc>, window_params = [{pipeline_mode = #tpu.pipeline_mode<synchronous>, transform_indices = @transform_0, window_bounds = array<i64: 4, 4>}, {pipeline_mode = #tpu.pipeline_mode<synchronous>, transform_indices = @transform_1, window_bounds = array<i64: 88, 4, 96>}, {pipeline_mode = #tpu.pipeline_mode<synchronous>, transform_indices = @transform_2, window_bounds = array<i64: 88, 4, 4>}, {pipeline_mode = #tpu.pipeline_mode<synchronous>, transform_indices = @transform_3, window_bounds = array<i64: 88, 4, 4>}, {pipeline_mode = #tpu.pipeline_mode<synchronous>, transform_indices = @transform_4, window_bounds = array<i64: 224, 128>}, {pipeline_mode = #tpu.pipeline_mode<synchronous>, transform_indices = @transform_5, window_bounds = array<i64: 11, 4, 4>}, {pipeline_mode = #tpu.pipeline_mode<synchronous>, transform_indices = @transform_6, window_bounds = array<i64: 4, 1>}]} {
    %c0 = arith.constant 0 : index
    %c0_0 = arith.constant 0 : index
    %0 = vector.load %arg5[%c0, %c0_0] : memref<224x128xf32, #tpu.memory_space<vmem>>, vector<4x96xf32>
    %c8 = arith.constant 8 : index
    %c0_1 = arith.constant 0 : index
    %1 = vector.load %arg5[%c8, %c0_1] : memref<224x128xf32, #tpu.memory_space<vmem>>, vector<96x64xf32>
    %c104 = arith.constant 104 : index
    %c0_2 = arith.constant 0 : index
    %2 = vector.load %arg5[%c104, %c0_2] : memref<224x128xf32, #tpu.memory_space<vmem>>, vector<1x64xf32>
    %c112 = arith.constant 112 : index
    %c0_3 = arith.constant 0 : index
    %3 = vector.load %arg5[%c112, %c0_3] : memref<224x128xf32, #tpu.memory_space<vmem>>, vector<64x8xf32>
    %c176 = arith.constant 176 : index
    %c0_4 = arith.constant 0 : index
    %4 = vector.load %arg5[%c176, %c0_4] : memref<224x128xf32, #tpu.memory_space<vmem>>, vector<1x8xf32>
    %c184 = arith.constant 184 : index
    %c0_5 = arith.constant 0 : index
    %5 = vector.load %arg5[%c184, %c0_5] : memref<224x128xf32, #tpu.memory_space<vmem>>, vector<32x4xf32>
    %c216 = arith.constant 216 : index
    %c0_6 = arith.constant 0 : index
    %6 = vector.load %arg5[%c216, %c0_6] : memref<224x128xf32, #tpu.memory_space<vmem>>, vector<1x4xf32>
    %c0_7 = arith.constant 0 : index
    %c0_8 = arith.constant 0 : index
    %7 = vector.load %arg1[%c0_7, %c0_8] : memref<4x4xf32, #tpu.memory_space<vmem>>, vector<4x4xf32>
    %cst = arith.constant 0.000000e+00 : f32
    %8 = vector.broadcast %cst : f32 to vector<4x1xf32>
    %c0_i32 = arith.constant 0 : i32
    %c11_i32 = arith.constant 11 : i32
    %9 = arith.addi %c0_i32, %c11_i32 : i32
    %c1_i32 = arith.constant 1 : i32
    %10:2 = scf.for %arg8 = %c0_i32 to %9 step %c1_i32 iter_args(%arg9 = %7, %arg10 = %8) -> (vector<4x4xf32>, vector<4x1xf32>)  : i32 {
      %c8_i32 = arith.constant 8 : i32
      %12 = arith.muli %arg8, %c8_i32 : i32
      %c0_i32_12 = arith.constant 0 : i32
      %13 = arith.addi %12, %c0_i32_12 : i32
      %cst_13 = arith.constant dense<0.000000e+00> : vector<4x96xf32>
      %14 = tpu.matmul %arg9, %0, %cst_13 {dimension_numbers = #tpu.dot_dimension_numbers<[1], [0], [0], [1], [0, 0, 1, 1], [], []>} : vector<4x4xf32>, vector<4x96xf32>, vector<4x96xf32> -> vector<4x96xf32>
      %15 = arith.index_cast %13 : i32 to index
      %c0_14 = arith.constant 0 : index
      %c0_15 = arith.constant 0 : index
      %16 = vector.load %arg2[%15, %c0_14, %c0_15] : memref<88x4x96xf32, #tpu.memory_space<vmem>>, vector<1x4x96xf32>
      %17 = vector.shape_cast %16 : vector<1x4x96xf32> to vector<4x96xf32>
      %18 = arith.addf %14, %17 : vector<4x96xf32>
      %19 = math.absf %18 : vector<4x96xf32>
      %cst_16 = arith.constant 0.000000e+00 : f32
      %20 = vector.broadcast %cst_16 : f32 to vector<4x96xf32>
      %21 = arith.subf %20, %19 : vector<4x96xf32>
      %22 = math.exp %21 : vector<4x96xf32>
      %23 = math.log1p %22 : vector<4x96xf32>
      %cst_17 = arith.constant 0.000000e+00 : f32
      %24 = vector.broadcast %cst_17 : f32 to vector<4x96xf32>
      %25 = arith.maximumf %18, %24 : vector<4x96xf32>
      %26 = arith.addf %23, %25 : vector<4x96xf32>
      %cst_18 = arith.constant dense<0.000000e+00> : vector<4x64xf32>
      %27 = tpu.matmul %26, %1, %cst_18 {dimension_numbers = #tpu.dot_dimension_numbers<[1], [0], [0], [1], [0, 0, 1, 1], [], []>} : vector<4x96xf32>, vector<96x64xf32>, vector<4x64xf32> -> vector<4x64xf32>
      %28 = vector.broadcast %2 : vector<1x64xf32> to vector<4x64xf32>
      %29 = arith.addf %27, %28 : vector<4x64xf32>
      %30 = math.absf %29 : vector<4x64xf32>
      %cst_19 = arith.constant 0.000000e+00 : f32
      %31 = vector.broadcast %cst_19 : f32 to vector<4x64xf32>
      %32 = arith.subf %31, %30 : vector<4x64xf32>
      %33 = math.exp %32 : vector<4x64xf32>
      %34 = math.log1p %33 : vector<4x64xf32>
      %cst_20 = arith.constant 0.000000e+00 : f32
      %35 = vector.broadcast %cst_20 : f32 to vector<4x64xf32>
      %36 = arith.maximumf %29, %35 : vector<4x64xf32>
      %37 = arith.addf %34, %36 : vector<4x64xf32>
      %cst_21 = arith.constant dense<0.000000e+00> : vector<4x8xf32>
      %38 = tpu.matmul %37, %3, %cst_21 {dimension_numbers = #tpu.dot_dimension_numbers<[1], [0], [0], [1], [0, 0, 1, 1], [], []>} : vector<4x64xf32>, vector<64x8xf32>, vector<4x8xf32> -> vector<4x8xf32>
      %39 = vector.broadcast %4 : vector<1x8xf32> to vector<4x8xf32>
      %40 = arith.addf %38, %39 : vector<4x8xf32>
      %41 = vector.extract_strided_slice %40 {offsets = [0, 0], sizes = [4, 4], strides = [1, 1]} : vector<4x8xf32> to vector<4x4xf32>
      %42 = vector.extract_strided_slice %40 {offsets = [0, 4], sizes = [4, 4], strides = [1, 1]} : vector<4x8xf32> to vector<4x4xf32>
      %43 = vector.extract_strided_slice %26 {offsets = [0, 32], sizes = [4, 32], strides = [1, 1]} : vector<4x96xf32> to vector<4x32xf32>
      %cst_22 = arith.constant dense<0.000000e+00> : vector<4x4xf32>
      %44 = tpu.matmul %43, %5, %cst_22 {dimension_numbers = #tpu.dot_dimension_numbers<[1], [0], [0], [1], [0, 0, 1, 1], [], []>} : vector<4x32xf32>, vector<32x4xf32>, vector<4x4xf32> -> vector<4x4xf32>
      %45 = vector.broadcast %6 : vector<1x4xf32> to vector<4x4xf32>
      %46 = arith.addf %44, %45 : vector<4x4xf32>
      %cst_23 = arith.constant 0.000000e+00 : f32
      %47 = vector.broadcast %cst_23 : f32 to vector<4x4xf32>
      %48 = arith.subf %47, %46 : vector<4x4xf32>
      %49 = math.exp %48 : vector<4x4xf32>
      %cst_24 = arith.constant 1.000000e+00 : f32
      %50 = vector.broadcast %cst_24 : f32 to vector<4x4xf32>
      %51 = arith.addf %50, %49 : vector<4x4xf32>
      %cst_25 = arith.constant 1.000000e+00 : f32
      %52 = vector.broadcast %cst_25 : f32 to vector<4x4xf32>
      %53 = arith.divf %52, %51 : vector<4x4xf32>
      %54 = arith.index_cast %13 : i32 to index
      %c0_26 = arith.constant 0 : index
      %c0_27 = arith.constant 0 : index
      %55 = vector.load %arg4[%54, %c0_26, %c0_27] : memref<88x4x4xf32, #tpu.memory_space<vmem>>, vector<1x4x4xf32>
      %56 = vector.shape_cast %55 : vector<1x4x4xf32> to vector<4x4xf32>
      %57 = arith.subf %42, %41 : vector<4x4xf32>
      %58 = arith.mulf %56, %57 : vector<4x4xf32>
      %59 = tpu.reciprocal %53 {approx = true} : vector<4x4xf32> -> vector<4x4xf32>
      %60 = arith.mulf %58, %59 : vector<4x4xf32>
      %61 = arith.mulf %60, %60 : vector<4x4xf32>
      %cst_28 = arith.constant dense<0.000000e+00> : vector<4xf32>
      %62 = vector.multi_reduction <add>, %61, %cst_28 [1] : vector<4x4xf32> to vector<4xf32>
      %63 = vector.shape_cast %62 : vector<4xf32> to vector<4x1xf32>
      %cst_29 = arith.constant 5.000000e-03 : f32
      %64 = vector.broadcast %cst_29 : f32 to vector<4x1xf32>
      %65 = arith.mulf %64, %63 : vector<4x1xf32>
      %66 = arith.addf %arg10, %65 : vector<4x1xf32>
      %67 = arith.addf %41, %58 : vector<4x4xf32>
      %cst_30 = arith.constant 0.00999999977 : f32
      %68 = vector.broadcast %cst_30 : f32 to vector<4x4xf32>
      %69 = arith.mulf %67, %68 : vector<4x4xf32>
      %70 = arith.addf %arg9, %69 : vector<4x4xf32>
      %71 = arith.index_cast %13 : i32 to index
      %c0_31 = arith.constant 0 : index
      %c0_32 = arith.constant 0 : index
      %72 = vector.load %arg3[%71, %c0_31, %c0_32] : memref<88x4x4xf32, #tpu.memory_space<vmem>>, vector<1x4x4xf32>
      %73 = vector.shape_cast %72 : vector<1x4x4xf32> to vector<4x4xf32>
      %cst_33 = arith.constant 1.000000e-01 : f32
      %74 = vector.broadcast %cst_33 : f32 to vector<4x4xf32>
      %75 = arith.mulf %74, %73 : vector<4x4xf32>
      %76 = arith.mulf %53, %75 : vector<4x4xf32>
      %77 = arith.addf %70, %76 : vector<4x4xf32>
      %c8_i32_34 = arith.constant 8 : i32
      %78 = arith.muli %arg8, %c8_i32_34 : i32
      %c1_i32_35 = arith.constant 1 : i32
      %79 = arith.addi %78, %c1_i32_35 : i32
      %cst_36 = arith.constant dense<0.000000e+00> : vector<4x96xf32>
      %80 = tpu.matmul %77, %0, %cst_36 {dimension_numbers = #tpu.dot_dimension_numbers<[1], [0], [0], [1], [0, 0, 1, 1], [], []>} : vector<4x4xf32>, vector<4x96xf32>, vector<4x96xf32> -> vector<4x96xf32>
      %81 = arith.index_cast %79 : i32 to index
      %c0_37 = arith.constant 0 : index
      %c0_38 = arith.constant 0 : index
      %82 = vector.load %arg2[%81, %c0_37, %c0_38] : memref<88x4x96xf32, #tpu.memory_space<vmem>>, vector<1x4x96xf32>
      %83 = vector.shape_cast %82 : vector<1x4x96xf32> to vector<4x96xf32>
      %84 = arith.addf %80, %83 : vector<4x96xf32>
      %85 = math.absf %84 : vector<4x96xf32>
      %cst_39 = arith.constant 0.000000e+00 : f32
      %86 = vector.broadcast %cst_39 : f32 to vector<4x96xf32>
      %87 = arith.subf %86, %85 : vector<4x96xf32>
      %88 = math.exp %87 : vector<4x96xf32>
      %89 = math.log1p %88 : vector<4x96xf32>
      %cst_40 = arith.constant 0.000000e+00 : f32
      %90 = vector.broadcast %cst_40 : f32 to vector<4x96xf32>
      %91 = arith.maximumf %84, %90 : vector<4x96xf32>
      %92 = arith.addf %89, %91 : vector<4x96xf32>
      %cst_41 = arith.constant dense<0.000000e+00> : vector<4x64xf32>
      %93 = tpu.matmul %92, %1, %cst_41 {dimension_numbers = #tpu.dot_dimension_numbers<[1], [0], [0], [1], [0, 0, 1, 1], [], []>} : vector<4x96xf32>, vector<96x64xf32>, vector<4x64xf32> -> vector<4x64xf32>
      %94 = vector.broadcast %2 : vector<1x64xf32> to vector<4x64xf32>
      %95 = arith.addf %93, %94 : vector<4x64xf32>
      %96 = math.absf %95 : vector<4x64xf32>
      %cst_42 = arith.constant 0.000000e+00 : f32
      %97 = vector.broadcast %cst_42 : f32 to vector<4x64xf32>
      %98 = arith.subf %97, %96 : vector<4x64xf32>
      %99 = math.exp %98 : vector<4x64xf32>
      %100 = math.log1p %99 : vector<4x64xf32>
      %cst_43 = arith.constant 0.000000e+00 : f32
      %101 = vector.broadcast %cst_43 : f32 to vector<4x64xf32>
      %102 = arith.maximumf %95, %101 : vector<4x64xf32>
      %103 = arith.addf %100, %102 : vector<4x64xf32>
      %cst_44 = arith.constant dense<0.000000e+00> : vector<4x8xf32>
      %104 = tpu.matmul %103, %3, %cst_44 {dimension_numbers = #tpu.dot_dimension_numbers<[1], [0], [0], [1], [0, 0, 1, 1], [], []>} : vector<4x64xf32>, vector<64x8xf32>, vector<4x8xf32> -> vector<4x8xf32>
      %105 = vector.broadcast %4 : vector<1x8xf32> to vector<4x8xf32>
      %106 = arith.addf %104, %105 : vector<4x8xf32>
      %107 = vector.extract_strided_slice %106 {offsets = [0, 0], sizes = [4, 4], strides = [1, 1]} : vector<4x8xf32> to vector<4x4xf32>
      %108 = vector.extract_strided_slice %106 {offsets = [0, 4], sizes = [4, 4], strides = [1, 1]} : vector<4x8xf32> to vector<4x4xf32>
      %109 = vector.extract_strided_slice %92 {offsets = [0, 32], sizes = [4, 32], strides = [1, 1]} : vector<4x96xf32> to vector<4x32xf32>
      %cst_45 = arith.constant dense<0.000000e+00> : vector<4x4xf32>
      %110 = tpu.matmul %109, %5, %cst_45 {dimension_numbers = #tpu.dot_dimension_numbers<[1], [0], [0], [1], [0, 0, 1, 1], [], []>} : vector<4x32xf32>, vector<32x4xf32>, vector<4x4xf32> -> vector<4x4xf32>
      %111 = vector.broadcast %6 : vector<1x4xf32> to vector<4x4xf32>
      %112 = arith.addf %110, %111 : vector<4x4xf32>
      %cst_46 = arith.constant 0.000000e+00 : f32
      %113 = vector.broadcast %cst_46 : f32 to vector<4x4xf32>
      %114 = arith.subf %113, %112 : vector<4x4xf32>
      %115 = math.exp %114 : vector<4x4xf32>
      %cst_47 = arith.constant 1.000000e+00 : f32
      %116 = vector.broadcast %cst_47 : f32 to vector<4x4xf32>
      %117 = arith.addf %116, %115 : vector<4x4xf32>
      %cst_48 = arith.constant 1.000000e+00 : f32
      %118 = vector.broadcast %cst_48 : f32 to vector<4x4xf32>
      %119 = arith.divf %118, %117 : vector<4x4xf32>
      %120 = arith.index_cast %79 : i32 to index
      %c0_49 = arith.constant 0 : index
      %c0_50 = arith.constant 0 : index
      %121 = vector.load %arg4[%120, %c0_49, %c0_50] : memref<88x4x4xf32, #tpu.memory_space<vmem>>, vector<1x4x4xf32>
      %122 = vector.shape_cast %121 : vector<1x4x4xf32> to vector<4x4xf32>
      %123 = arith.subf %108, %107 : vector<4x4xf32>
      %124 = arith.mulf %122, %123 : vector<4x4xf32>
      %125 = tpu.reciprocal %119 {approx = true} : vector<4x4xf32> -> vector<4x4xf32>
      %126 = arith.mulf %124, %125 : vector<4x4xf32>
      %127 = arith.mulf %126, %126 : vector<4x4xf32>
      %cst_51 = arith.constant dense<0.000000e+00> : vector<4xf32>
      %128 = vector.multi_reduction <add>, %127, %cst_51 [1] : vector<4x4xf32> to vector<4xf32>
      %129 = vector.shape_cast %128 : vector<4xf32> to vector<4x1xf32>
      %cst_52 = arith.constant 5.000000e-03 : f32
      %130 = vector.broadcast %cst_52 : f32 to vector<4x1xf32>
      %131 = arith.mulf %130, %129 : vector<4x1xf32>
      %132 = arith.addf %66, %131 : vector<4x1xf32>
      %133 = arith.addf %107, %124 : vector<4x4xf32>
      %cst_53 = arith.constant 0.00999999977 : f32
      %134 = vector.broadcast %cst_53 : f32 to vector<4x4xf32>
      %135 = arith.mulf %133, %134 : vector<4x4xf32>
      %136 = arith.addf %77, %135 : vector<4x4xf32>
      %137 = arith.index_cast %79 : i32 to index
      %c0_54 = arith.constant 0 : index
      %c0_55 = arith.constant 0 : index
      %138 = vector.load %arg3[%137, %c0_54, %c0_55] : memref<88x4x4xf32, #tpu.memory_space<vmem>>, vector<1x4x4xf32>
      %139 = vector.shape_cast %138 : vector<1x4x4xf32> to vector<4x4xf32>
      %cst_56 = arith.constant 1.000000e-01 : f32
      %140 = vector.broadcast %cst_56 : f32 to vector<4x4xf32>
      %141 = arith.mulf %140, %139 : vector<4x4xf32>
      %142 = arith.mulf %119, %141 : vector<4x4xf32>
      %143 = arith.addf %136, %142 : vector<4x4xf32>
      %c8_i32_57 = arith.constant 8 : i32
      %144 = arith.muli %arg8, %c8_i32_57 : i32
      %c2_i32 = arith.constant 2 : i32
      %145 = arith.addi %144, %c2_i32 : i32
      %cst_58 = arith.constant dense<0.000000e+00> : vector<4x96xf32>
      %146 = tpu.matmul %143, %0, %cst_58 {dimension_numbers = #tpu.dot_dimension_numbers<[1], [0], [0], [1], [0, 0, 1, 1], [], []>} : vector<4x4xf32>, vector<4x96xf32>, vector<4x96xf32> -> vector<4x96xf32>
      %147 = arith.index_cast %145 : i32 to index
      %c0_59 = arith.constant 0 : index
      %c0_60 = arith.constant 0 : index
      %148 = vector.load %arg2[%147, %c0_59, %c0_60] : memref<88x4x96xf32, #tpu.memory_space<vmem>>, vector<1x4x96xf32>
      %149 = vector.shape_cast %148 : vector<1x4x96xf32> to vector<4x96xf32>
      %150 = arith.addf %146, %149 : vector<4x96xf32>
      %151 = math.absf %150 : vector<4x96xf32>
      %cst_61 = arith.constant 0.000000e+00 : f32
      %152 = vector.broadcast %cst_61 : f32 to vector<4x96xf32>
      %153 = arith.subf %152, %151 : vector<4x96xf32>
      %154 = math.exp %153 : vector<4x96xf32>
      %155 = math.log1p %154 : vector<4x96xf32>
      %cst_62 = arith.constant 0.000000e+00 : f32
      %156 = vector.broadcast %cst_62 : f32 to vector<4x96xf32>
      %157 = arith.maximumf %150, %156 : vector<4x96xf32>
      %158 = arith.addf %155, %157 : vector<4x96xf32>
      %cst_63 = arith.constant dense<0.000000e+00> : vector<4x64xf32>
      %159 = tpu.matmul %158, %1, %cst_63 {dimension_numbers = #tpu.dot_dimension_numbers<[1], [0], [0], [1], [0, 0, 1, 1], [], []>} : vector<4x96xf32>, vector<96x64xf32>, vector<4x64xf32> -> vector<4x64xf32>
      %160 = vector.broadcast %2 : vector<1x64xf32> to vector<4x64xf32>
      %161 = arith.addf %159, %160 : vector<4x64xf32>
      %162 = math.absf %161 : vector<4x64xf32>
      %cst_64 = arith.constant 0.000000e+00 : f32
      %163 = vector.broadcast %cst_64 : f32 to vector<4x64xf32>
      %164 = arith.subf %163, %162 : vector<4x64xf32>
      %165 = math.exp %164 : vector<4x64xf32>
      %166 = math.log1p %165 : vector<4x64xf32>
      %cst_65 = arith.constant 0.000000e+00 : f32
      %167 = vector.broadcast %cst_65 : f32 to vector<4x64xf32>
      %168 = arith.maximumf %161, %167 : vector<4x64xf32>
      %169 = arith.addf %166, %168 : vector<4x64xf32>
      %cst_66 = arith.constant dense<0.000000e+00> : vector<4x8xf32>
      %170 = tpu.matmul %169, %3, %cst_66 {dimension_numbers = #tpu.dot_dimension_numbers<[1], [0], [0], [1], [0, 0, 1, 1], [], []>} : vector<4x64xf32>, vector<64x8xf32>, vector<4x8xf32> -> vector<4x8xf32>
      %171 = vector.broadcast %4 : vector<1x8xf32> to vector<4x8xf32>
      %172 = arith.addf %170, %171 : vector<4x8xf32>
      %173 = vector.extract_strided_slice %172 {offsets = [0, 0], sizes = [4, 4], strides = [1, 1]} : vector<4x8xf32> to vector<4x4xf32>
      %174 = vector.extract_strided_slice %172 {offsets = [0, 4], sizes = [4, 4], strides = [1, 1]} : vector<4x8xf32> to vector<4x4xf32>
      %175 = vector.extract_strided_slice %158 {offsets = [0, 32], sizes = [4, 32], strides = [1, 1]} : vector<4x96xf32> to vector<4x32xf32>
      %cst_67 = arith.constant dense<0.000000e+00> : vector<4x4xf32>
      %176 = tpu.matmul %175, %5, %cst_67 {dimension_numbers = #tpu.dot_dimension_numbers<[1], [0], [0], [1], [0, 0, 1, 1], [], []>} : vector<4x32xf32>, vector<32x4xf32>, vector<4x4xf32> -> vector<4x4xf32>
      %177 = vector.broadcast %6 : vector<1x4xf32> to vector<4x4xf32>
      %178 = arith.addf %176, %177 : vector<4x4xf32>
      %cst_68 = arith.constant 0.000000e+00 : f32
      %179 = vector.broadcast %cst_68 : f32 to vector<4x4xf32>
      %180 = arith.subf %179, %178 : vector<4x4xf32>
      %181 = math.exp %180 : vector<4x4xf32>
      %cst_69 = arith.constant 1.000000e+00 : f32
      %182 = vector.broadcast %cst_69 : f32 to vector<4x4xf32>
      %183 = arith.addf %182, %181 : vector<4x4xf32>
      %cst_70 = arith.constant 1.000000e+00 : f32
      %184 = vector.broadcast %cst_70 : f32 to vector<4x4xf32>
      %185 = arith.divf %184, %183 : vector<4x4xf32>
      %186 = arith.index_cast %145 : i32 to index
      %c0_71 = arith.constant 0 : index
      %c0_72 = arith.constant 0 : index
      %187 = vector.load %arg4[%186, %c0_71, %c0_72] : memref<88x4x4xf32, #tpu.memory_space<vmem>>, vector<1x4x4xf32>
      %188 = vector.shape_cast %187 : vector<1x4x4xf32> to vector<4x4xf32>
      %189 = arith.subf %174, %173 : vector<4x4xf32>
      %190 = arith.mulf %188, %189 : vector<4x4xf32>
      %191 = tpu.reciprocal %185 {approx = true} : vector<4x4xf32> -> vector<4x4xf32>
      %192 = arith.mulf %190, %191 : vector<4x4xf32>
      %193 = arith.mulf %192, %192 : vector<4x4xf32>
      %cst_73 = arith.constant dense<0.000000e+00> : vector<4xf32>
      %194 = vector.multi_reduction <add>, %193, %cst_73 [1] : vector<4x4xf32> to vector<4xf32>
      %195 = vector.shape_cast %194 : vector<4xf32> to vector<4x1xf32>
      %cst_74 = arith.constant 5.000000e-03 : f32
      %196 = vector.broadcast %cst_74 : f32 to vector<4x1xf32>
      %197 = arith.mulf %196, %195 : vector<4x1xf32>
      %198 = arith.addf %132, %197 : vector<4x1xf32>
      %199 = arith.addf %173, %190 : vector<4x4xf32>
      %cst_75 = arith.constant 0.00999999977 : f32
      %200 = vector.broadcast %cst_75 : f32 to vector<4x4xf32>
      %201 = arith.mulf %199, %200 : vector<4x4xf32>
      %202 = arith.addf %143, %201 : vector<4x4xf32>
      %203 = arith.index_cast %145 : i32 to index
      %c0_76 = arith.constant 0 : index
      %c0_77 = arith.constant 0 : index
      %204 = vector.load %arg3[%203, %c0_76, %c0_77] : memref<88x4x4xf32, #tpu.memory_space<vmem>>, vector<1x4x4xf32>
      %205 = vector.shape_cast %204 : vector<1x4x4xf32> to vector<4x4xf32>
      %cst_78 = arith.constant 1.000000e-01 : f32
      %206 = vector.broadcast %cst_78 : f32 to vector<4x4xf32>
      %207 = arith.mulf %206, %205 : vector<4x4xf32>
      %208 = arith.mulf %185, %207 : vector<4x4xf32>
      %209 = arith.addf %202, %208 : vector<4x4xf32>
      %c8_i32_79 = arith.constant 8 : i32
      %210 = arith.muli %arg8, %c8_i32_79 : i32
      %c3_i32 = arith.constant 3 : i32
      %211 = arith.addi %210, %c3_i32 : i32
      %cst_80 = arith.constant dense<0.000000e+00> : vector<4x96xf32>
      %212 = tpu.matmul %209, %0, %cst_80 {dimension_numbers = #tpu.dot_dimension_numbers<[1], [0], [0], [1], [0, 0, 1, 1], [], []>} : vector<4x4xf32>, vector<4x96xf32>, vector<4x96xf32> -> vector<4x96xf32>
      %213 = arith.index_cast %211 : i32 to index
      %c0_81 = arith.constant 0 : index
      %c0_82 = arith.constant 0 : index
      %214 = vector.load %arg2[%213, %c0_81, %c0_82] : memref<88x4x96xf32, #tpu.memory_space<vmem>>, vector<1x4x96xf32>
      %215 = vector.shape_cast %214 : vector<1x4x96xf32> to vector<4x96xf32>
      %216 = arith.addf %212, %215 : vector<4x96xf32>
      %217 = math.absf %216 : vector<4x96xf32>
      %cst_83 = arith.constant 0.000000e+00 : f32
      %218 = vector.broadcast %cst_83 : f32 to vector<4x96xf32>
      %219 = arith.subf %218, %217 : vector<4x96xf32>
      %220 = math.exp %219 : vector<4x96xf32>
      %221 = math.log1p %220 : vector<4x96xf32>
      %cst_84 = arith.constant 0.000000e+00 : f32
      %222 = vector.broadcast %cst_84 : f32 to vector<4x96xf32>
      %223 = arith.maximumf %216, %222 : vector<4x96xf32>
      %224 = arith.addf %221, %223 : vector<4x96xf32>
      %cst_85 = arith.constant dense<0.000000e+00> : vector<4x64xf32>
      %225 = tpu.matmul %224, %1, %cst_85 {dimension_numbers = #tpu.dot_dimension_numbers<[1], [0], [0], [1], [0, 0, 1, 1], [], []>} : vector<4x96xf32>, vector<96x64xf32>, vector<4x64xf32> -> vector<4x64xf32>
      %226 = vector.broadcast %2 : vector<1x64xf32> to vector<4x64xf32>
      %227 = arith.addf %225, %226 : vector<4x64xf32>
      %228 = math.absf %227 : vector<4x64xf32>
      %cst_86 = arith.constant 0.000000e+00 : f32
      %229 = vector.broadcast %cst_86 : f32 to vector<4x64xf32>
      %230 = arith.subf %229, %228 : vector<4x64xf32>
      %231 = math.exp %230 : vector<4x64xf32>
      %232 = math.log1p %231 : vector<4x64xf32>
      %cst_87 = arith.constant 0.000000e+00 : f32
      %233 = vector.broadcast %cst_87 : f32 to vector<4x64xf32>
      %234 = arith.maximumf %227, %233 : vector<4x64xf32>
      %235 = arith.addf %232, %234 : vector<4x64xf32>
      %cst_88 = arith.constant dense<0.000000e+00> : vector<4x8xf32>
      %236 = tpu.matmul %235, %3, %cst_88 {dimension_numbers = #tpu.dot_dimension_numbers<[1], [0], [0], [1], [0, 0, 1, 1], [], []>} : vector<4x64xf32>, vector<64x8xf32>, vector<4x8xf32> -> vector<4x8xf32>
      %237 = vector.broadcast %4 : vector<1x8xf32> to vector<4x8xf32>
      %238 = arith.addf %236, %237 : vector<4x8xf32>
      %239 = vector.extract_strided_slice %238 {offsets = [0, 0], sizes = [4, 4], strides = [1, 1]} : vector<4x8xf32> to vector<4x4xf32>
      %240 = vector.extract_strided_slice %238 {offsets = [0, 4], sizes = [4, 4], strides = [1, 1]} : vector<4x8xf32> to vector<4x4xf32>
      %241 = vector.extract_strided_slice %224 {offsets = [0, 32], sizes = [4, 32], strides = [1, 1]} : vector<4x96xf32> to vector<4x32xf32>
      %cst_89 = arith.constant dense<0.000000e+00> : vector<4x4xf32>
      %242 = tpu.matmul %241, %5, %cst_89 {dimension_numbers = #tpu.dot_dimension_numbers<[1], [0], [0], [1], [0, 0, 1, 1], [], []>} : vector<4x32xf32>, vector<32x4xf32>, vector<4x4xf32> -> vector<4x4xf32>
      %243 = vector.broadcast %6 : vector<1x4xf32> to vector<4x4xf32>
      %244 = arith.addf %242, %243 : vector<4x4xf32>
      %cst_90 = arith.constant 0.000000e+00 : f32
      %245 = vector.broadcast %cst_90 : f32 to vector<4x4xf32>
      %246 = arith.subf %245, %244 : vector<4x4xf32>
      %247 = math.exp %246 : vector<4x4xf32>
      %cst_91 = arith.constant 1.000000e+00 : f32
      %248 = vector.broadcast %cst_91 : f32 to vector<4x4xf32>
      %249 = arith.addf %248, %247 : vector<4x4xf32>
      %cst_92 = arith.constant 1.000000e+00 : f32
      %250 = vector.broadcast %cst_92 : f32 to vector<4x4xf32>
      %251 = arith.divf %250, %249 : vector<4x4xf32>
      %252 = arith.index_cast %211 : i32 to index
      %c0_93 = arith.constant 0 : index
      %c0_94 = arith.constant 0 : index
      %253 = vector.load %arg4[%252, %c0_93, %c0_94] : memref<88x4x4xf32, #tpu.memory_space<vmem>>, vector<1x4x4xf32>
      %254 = vector.shape_cast %253 : vector<1x4x4xf32> to vector<4x4xf32>
      %255 = arith.subf %240, %239 : vector<4x4xf32>
      %256 = arith.mulf %254, %255 : vector<4x4xf32>
      %257 = tpu.reciprocal %251 {approx = true} : vector<4x4xf32> -> vector<4x4xf32>
      %258 = arith.mulf %256, %257 : vector<4x4xf32>
      %259 = arith.mulf %258, %258 : vector<4x4xf32>
      %cst_95 = arith.constant dense<0.000000e+00> : vector<4xf32>
      %260 = vector.multi_reduction <add>, %259, %cst_95 [1] : vector<4x4xf32> to vector<4xf32>
      %261 = vector.shape_cast %260 : vector<4xf32> to vector<4x1xf32>
      %cst_96 = arith.constant 5.000000e-03 : f32
      %262 = vector.broadcast %cst_96 : f32 to vector<4x1xf32>
      %263 = arith.mulf %262, %261 : vector<4x1xf32>
      %264 = arith.addf %198, %263 : vector<4x1xf32>
      %265 = arith.addf %239, %256 : vector<4x4xf32>
      %cst_97 = arith.constant 0.00999999977 : f32
      %266 = vector.broadcast %cst_97 : f32 to vector<4x4xf32>
      %267 = arith.mulf %265, %266 : vector<4x4xf32>
      %268 = arith.addf %209, %267 : vector<4x4xf32>
      %269 = arith.index_cast %211 : i32 to index
      %c0_98 = arith.constant 0 : index
      %c0_99 = arith.constant 0 : index
      %270 = vector.load %arg3[%269, %c0_98, %c0_99] : memref<88x4x4xf32, #tpu.memory_space<vmem>>, vector<1x4x4xf32>
      %271 = vector.shape_cast %270 : vector<1x4x4xf32> to vector<4x4xf32>
      %cst_100 = arith.constant 1.000000e-01 : f32
      %272 = vector.broadcast %cst_100 : f32 to vector<4x4xf32>
      %273 = arith.mulf %272, %271 : vector<4x4xf32>
      %274 = arith.mulf %251, %273 : vector<4x4xf32>
      %275 = arith.addf %268, %274 : vector<4x4xf32>
      %c8_i32_101 = arith.constant 8 : i32
      %276 = arith.muli %arg8, %c8_i32_101 : i32
      %c4_i32 = arith.constant 4 : i32
      %277 = arith.addi %276, %c4_i32 : i32
      %cst_102 = arith.constant dense<0.000000e+00> : vector<4x96xf32>
      %278 = tpu.matmul %275, %0, %cst_102 {dimension_numbers = #tpu.dot_dimension_numbers<[1], [0], [0], [1], [0, 0, 1, 1], [], []>} : vector<4x4xf32>, vector<4x96xf32>, vector<4x96xf32> -> vector<4x96xf32>
      %279 = arith.index_cast %277 : i32 to index
      %c0_103 = arith.constant 0 : index
      %c0_104 = arith.constant 0 : index
      %280 = vector.load %arg2[%279, %c0_103, %c0_104] : memref<88x4x96xf32, #tpu.memory_space<vmem>>, vector<1x4x96xf32>
      %281 = vector.shape_cast %280 : vector<1x4x96xf32> to vector<4x96xf32>
      %282 = arith.addf %278, %281 : vector<4x96xf32>
      %283 = math.absf %282 : vector<4x96xf32>
      %cst_105 = arith.constant 0.000000e+00 : f32
      %284 = vector.broadcast %cst_105 : f32 to vector<4x96xf32>
      %285 = arith.subf %284, %283 : vector<4x96xf32>
      %286 = math.exp %285 : vector<4x96xf32>
      %287 = math.log1p %286 : vector<4x96xf32>
      %cst_106 = arith.constant 0.000000e+00 : f32
      %288 = vector.broadcast %cst_106 : f32 to vector<4x96xf32>
      %289 = arith.maximumf %282, %288 : vector<4x96xf32>
      %290 = arith.addf %287, %289 : vector<4x96xf32>
      %cst_107 = arith.constant dense<0.000000e+00> : vector<4x64xf32>
      %291 = tpu.matmul %290, %1, %cst_107 {dimension_numbers = #tpu.dot_dimension_numbers<[1], [0], [0], [1], [0, 0, 1, 1], [], []>} : vector<4x96xf32>, vector<96x64xf32>, vector<4x64xf32> -> vector<4x64xf32>
      %292 = vector.broadcast %2 : vector<1x64xf32> to vector<4x64xf32>
      %293 = arith.addf %291, %292 : vector<4x64xf32>
      %294 = math.absf %293 : vector<4x64xf32>
      %cst_108 = arith.constant 0.000000e+00 : f32
      %295 = vector.broadcast %cst_108 : f32 to vector<4x64xf32>
      %296 = arith.subf %295, %294 : vector<4x64xf32>
      %297 = math.exp %296 : vector<4x64xf32>
      %298 = math.log1p %297 : vector<4x64xf32>
      %cst_109 = arith.constant 0.000000e+00 : f32
      %299 = vector.broadcast %cst_109 : f32 to vector<4x64xf32>
      %300 = arith.maximumf %293, %299 : vector<4x64xf32>
      %301 = arith.addf %298, %300 : vector<4x64xf32>
      %cst_110 = arith.constant dense<0.000000e+00> : vector<4x8xf32>
      %302 = tpu.matmul %301, %3, %cst_110 {dimension_numbers = #tpu.dot_dimension_numbers<[1], [0], [0], [1], [0, 0, 1, 1], [], []>} : vector<4x64xf32>, vector<64x8xf32>, vector<4x8xf32> -> vector<4x8xf32>
      %303 = vector.broadcast %4 : vector<1x8xf32> to vector<4x8xf32>
      %304 = arith.addf %302, %303 : vector<4x8xf32>
      %305 = vector.extract_strided_slice %304 {offsets = [0, 0], sizes = [4, 4], strides = [1, 1]} : vector<4x8xf32> to vector<4x4xf32>
      %306 = vector.extract_strided_slice %304 {offsets = [0, 4], sizes = [4, 4], strides = [1, 1]} : vector<4x8xf32> to vector<4x4xf32>
      %307 = vector.extract_strided_slice %290 {offsets = [0, 32], sizes = [4, 32], strides = [1, 1]} : vector<4x96xf32> to vector<4x32xf32>
      %cst_111 = arith.constant dense<0.000000e+00> : vector<4x4xf32>
      %308 = tpu.matmul %307, %5, %cst_111 {dimension_numbers = #tpu.dot_dimension_numbers<[1], [0], [0], [1], [0, 0, 1, 1], [], []>} : vector<4x32xf32>, vector<32x4xf32>, vector<4x4xf32> -> vector<4x4xf32>
      %309 = vector.broadcast %6 : vector<1x4xf32> to vector<4x4xf32>
      %310 = arith.addf %308, %309 : vector<4x4xf32>
      %cst_112 = arith.constant 0.000000e+00 : f32
      %311 = vector.broadcast %cst_112 : f32 to vector<4x4xf32>
      %312 = arith.subf %311, %310 : vector<4x4xf32>
      %313 = math.exp %312 : vector<4x4xf32>
      %cst_113 = arith.constant 1.000000e+00 : f32
      %314 = vector.broadcast %cst_113 : f32 to vector<4x4xf32>
      %315 = arith.addf %314, %313 : vector<4x4xf32>
      %cst_114 = arith.constant 1.000000e+00 : f32
      %316 = vector.broadcast %cst_114 : f32 to vector<4x4xf32>
      %317 = arith.divf %316, %315 : vector<4x4xf32>
      %318 = arith.index_cast %277 : i32 to index
      %c0_115 = arith.constant 0 : index
      %c0_116 = arith.constant 0 : index
      %319 = vector.load %arg4[%318, %c0_115, %c0_116] : memref<88x4x4xf32, #tpu.memory_space<vmem>>, vector<1x4x4xf32>
      %320 = vector.shape_cast %319 : vector<1x4x4xf32> to vector<4x4xf32>
      %321 = arith.subf %306, %305 : vector<4x4xf32>
      %322 = arith.mulf %320, %321 : vector<4x4xf32>
      %323 = tpu.reciprocal %317 {approx = true} : vector<4x4xf32> -> vector<4x4xf32>
      %324 = arith.mulf %322, %323 : vector<4x4xf32>
      %325 = arith.mulf %324, %324 : vector<4x4xf32>
      %cst_117 = arith.constant dense<0.000000e+00> : vector<4xf32>
      %326 = vector.multi_reduction <add>, %325, %cst_117 [1] : vector<4x4xf32> to vector<4xf32>
      %327 = vector.shape_cast %326 : vector<4xf32> to vector<4x1xf32>
      %cst_118 = arith.constant 5.000000e-03 : f32
      %328 = vector.broadcast %cst_118 : f32 to vector<4x1xf32>
      %329 = arith.mulf %328, %327 : vector<4x1xf32>
      %330 = arith.addf %264, %329 : vector<4x1xf32>
      %331 = arith.addf %305, %322 : vector<4x4xf32>
      %cst_119 = arith.constant 0.00999999977 : f32
      %332 = vector.broadcast %cst_119 : f32 to vector<4x4xf32>
      %333 = arith.mulf %331, %332 : vector<4x4xf32>
      %334 = arith.addf %275, %333 : vector<4x4xf32>
      %335 = arith.index_cast %277 : i32 to index
      %c0_120 = arith.constant 0 : index
      %c0_121 = arith.constant 0 : index
      %336 = vector.load %arg3[%335, %c0_120, %c0_121] : memref<88x4x4xf32, #tpu.memory_space<vmem>>, vector<1x4x4xf32>
      %337 = vector.shape_cast %336 : vector<1x4x4xf32> to vector<4x4xf32>
      %cst_122 = arith.constant 1.000000e-01 : f32
      %338 = vector.broadcast %cst_122 : f32 to vector<4x4xf32>
      %339 = arith.mulf %338, %337 : vector<4x4xf32>
      %340 = arith.mulf %317, %339 : vector<4x4xf32>
      %341 = arith.addf %334, %340 : vector<4x4xf32>
      %c8_i32_123 = arith.constant 8 : i32
      %342 = arith.muli %arg8, %c8_i32_123 : i32
      %c5_i32 = arith.constant 5 : i32
      %343 = arith.addi %342, %c5_i32 : i32
      %cst_124 = arith.constant dense<0.000000e+00> : vector<4x96xf32>
      %344 = tpu.matmul %341, %0, %cst_124 {dimension_numbers = #tpu.dot_dimension_numbers<[1], [0], [0], [1], [0, 0, 1, 1], [], []>} : vector<4x4xf32>, vector<4x96xf32>, vector<4x96xf32> -> vector<4x96xf32>
      %345 = arith.index_cast %343 : i32 to index
      %c0_125 = arith.constant 0 : index
      %c0_126 = arith.constant 0 : index
      %346 = vector.load %arg2[%345, %c0_125, %c0_126] : memref<88x4x96xf32, #tpu.memory_space<vmem>>, vector<1x4x96xf32>
      %347 = vector.shape_cast %346 : vector<1x4x96xf32> to vector<4x96xf32>
      %348 = arith.addf %344, %347 : vector<4x96xf32>
      %349 = math.absf %348 : vector<4x96xf32>
      %cst_127 = arith.constant 0.000000e+00 : f32
      %350 = vector.broadcast %cst_127 : f32 to vector<4x96xf32>
      %351 = arith.subf %350, %349 : vector<4x96xf32>
      %352 = math.exp %351 : vector<4x96xf32>
      %353 = math.log1p %352 : vector<4x96xf32>
      %cst_128 = arith.constant 0.000000e+00 : f32
      %354 = vector.broadcast %cst_128 : f32 to vector<4x96xf32>
      %355 = arith.maximumf %348, %354 : vector<4x96xf32>
      %356 = arith.addf %353, %355 : vector<4x96xf32>
      %cst_129 = arith.constant dense<0.000000e+00> : vector<4x64xf32>
      %357 = tpu.matmul %356, %1, %cst_129 {dimension_numbers = #tpu.dot_dimension_numbers<[1], [0], [0], [1], [0, 0, 1, 1], [], []>} : vector<4x96xf32>, vector<96x64xf32>, vector<4x64xf32> -> vector<4x64xf32>
      %358 = vector.broadcast %2 : vector<1x64xf32> to vector<4x64xf32>
      %359 = arith.addf %357, %358 : vector<4x64xf32>
      %360 = math.absf %359 : vector<4x64xf32>
      %cst_130 = arith.constant 0.000000e+00 : f32
      %361 = vector.broadcast %cst_130 : f32 to vector<4x64xf32>
      %362 = arith.subf %361, %360 : vector<4x64xf32>
      %363 = math.exp %362 : vector<4x64xf32>
      %364 = math.log1p %363 : vector<4x64xf32>
      %cst_131 = arith.constant 0.000000e+00 : f32
      %365 = vector.broadcast %cst_131 : f32 to vector<4x64xf32>
      %366 = arith.maximumf %359, %365 : vector<4x64xf32>
      %367 = arith.addf %364, %366 : vector<4x64xf32>
      %cst_132 = arith.constant dense<0.000000e+00> : vector<4x8xf32>
      %368 = tpu.matmul %367, %3, %cst_132 {dimension_numbers = #tpu.dot_dimension_numbers<[1], [0], [0], [1], [0, 0, 1, 1], [], []>} : vector<4x64xf32>, vector<64x8xf32>, vector<4x8xf32> -> vector<4x8xf32>
      %369 = vector.broadcast %4 : vector<1x8xf32> to vector<4x8xf32>
      %370 = arith.addf %368, %369 : vector<4x8xf32>
      %371 = vector.extract_strided_slice %370 {offsets = [0, 0], sizes = [4, 4], strides = [1, 1]} : vector<4x8xf32> to vector<4x4xf32>
      %372 = vector.extract_strided_slice %370 {offsets = [0, 4], sizes = [4, 4], strides = [1, 1]} : vector<4x8xf32> to vector<4x4xf32>
      %373 = vector.extract_strided_slice %356 {offsets = [0, 32], sizes = [4, 32], strides = [1, 1]} : vector<4x96xf32> to vector<4x32xf32>
      %cst_133 = arith.constant dense<0.000000e+00> : vector<4x4xf32>
      %374 = tpu.matmul %373, %5, %cst_133 {dimension_numbers = #tpu.dot_dimension_numbers<[1], [0], [0], [1], [0, 0, 1, 1], [], []>} : vector<4x32xf32>, vector<32x4xf32>, vector<4x4xf32> -> vector<4x4xf32>
      %375 = vector.broadcast %6 : vector<1x4xf32> to vector<4x4xf32>
      %376 = arith.addf %374, %375 : vector<4x4xf32>
      %cst_134 = arith.constant 0.000000e+00 : f32
      %377 = vector.broadcast %cst_134 : f32 to vector<4x4xf32>
      %378 = arith.subf %377, %376 : vector<4x4xf32>
      %379 = math.exp %378 : vector<4x4xf32>
      %cst_135 = arith.constant 1.000000e+00 : f32
      %380 = vector.broadcast %cst_135 : f32 to vector<4x4xf32>
      %381 = arith.addf %380, %379 : vector<4x4xf32>
      %cst_136 = arith.constant 1.000000e+00 : f32
      %382 = vector.broadcast %cst_136 : f32 to vector<4x4xf32>
      %383 = arith.divf %382, %381 : vector<4x4xf32>
      %384 = arith.index_cast %343 : i32 to index
      %c0_137 = arith.constant 0 : index
      %c0_138 = arith.constant 0 : index
      %385 = vector.load %arg4[%384, %c0_137, %c0_138] : memref<88x4x4xf32, #tpu.memory_space<vmem>>, vector<1x4x4xf32>
      %386 = vector.shape_cast %385 : vector<1x4x4xf32> to vector<4x4xf32>
      %387 = arith.subf %372, %371 : vector<4x4xf32>
      %388 = arith.mulf %386, %387 : vector<4x4xf32>
      %389 = tpu.reciprocal %383 {approx = true} : vector<4x4xf32> -> vector<4x4xf32>
      %390 = arith.mulf %388, %389 : vector<4x4xf32>
      %391 = arith.mulf %390, %390 : vector<4x4xf32>
      %cst_139 = arith.constant dense<0.000000e+00> : vector<4xf32>
      %392 = vector.multi_reduction <add>, %391, %cst_139 [1] : vector<4x4xf32> to vector<4xf32>
      %393 = vector.shape_cast %392 : vector<4xf32> to vector<4x1xf32>
      %cst_140 = arith.constant 5.000000e-03 : f32
      %394 = vector.broadcast %cst_140 : f32 to vector<4x1xf32>
      %395 = arith.mulf %394, %393 : vector<4x1xf32>
      %396 = arith.addf %330, %395 : vector<4x1xf32>
      %397 = arith.addf %371, %388 : vector<4x4xf32>
      %cst_141 = arith.constant 0.00999999977 : f32
      %398 = vector.broadcast %cst_141 : f32 to vector<4x4xf32>
      %399 = arith.mulf %397, %398 : vector<4x4xf32>
      %400 = arith.addf %341, %399 : vector<4x4xf32>
      %401 = arith.index_cast %343 : i32 to index
      %c0_142 = arith.constant 0 : index
      %c0_143 = arith.constant 0 : index
      %402 = vector.load %arg3[%401, %c0_142, %c0_143] : memref<88x4x4xf32, #tpu.memory_space<vmem>>, vector<1x4x4xf32>
      %403 = vector.shape_cast %402 : vector<1x4x4xf32> to vector<4x4xf32>
      %cst_144 = arith.constant 1.000000e-01 : f32
      %404 = vector.broadcast %cst_144 : f32 to vector<4x4xf32>
      %405 = arith.mulf %404, %403 : vector<4x4xf32>
      %406 = arith.mulf %383, %405 : vector<4x4xf32>
      %407 = arith.addf %400, %406 : vector<4x4xf32>
      %c8_i32_145 = arith.constant 8 : i32
      %408 = arith.muli %arg8, %c8_i32_145 : i32
      %c6_i32 = arith.constant 6 : i32
      %409 = arith.addi %408, %c6_i32 : i32
      %cst_146 = arith.constant dense<0.000000e+00> : vector<4x96xf32>
      %410 = tpu.matmul %407, %0, %cst_146 {dimension_numbers = #tpu.dot_dimension_numbers<[1], [0], [0], [1], [0, 0, 1, 1], [], []>} : vector<4x4xf32>, vector<4x96xf32>, vector<4x96xf32> -> vector<4x96xf32>
      %411 = arith.index_cast %409 : i32 to index
      %c0_147 = arith.constant 0 : index
      %c0_148 = arith.constant 0 : index
      %412 = vector.load %arg2[%411, %c0_147, %c0_148] : memref<88x4x96xf32, #tpu.memory_space<vmem>>, vector<1x4x96xf32>
      %413 = vector.shape_cast %412 : vector<1x4x96xf32> to vector<4x96xf32>
      %414 = arith.addf %410, %413 : vector<4x96xf32>
      %415 = math.absf %414 : vector<4x96xf32>
      %cst_149 = arith.constant 0.000000e+00 : f32
      %416 = vector.broadcast %cst_149 : f32 to vector<4x96xf32>
      %417 = arith.subf %416, %415 : vector<4x96xf32>
      %418 = math.exp %417 : vector<4x96xf32>
      %419 = math.log1p %418 : vector<4x96xf32>
      %cst_150 = arith.constant 0.000000e+00 : f32
      %420 = vector.broadcast %cst_150 : f32 to vector<4x96xf32>
      %421 = arith.maximumf %414, %420 : vector<4x96xf32>
      %422 = arith.addf %419, %421 : vector<4x96xf32>
      %cst_151 = arith.constant dense<0.000000e+00> : vector<4x64xf32>
      %423 = tpu.matmul %422, %1, %cst_151 {dimension_numbers = #tpu.dot_dimension_numbers<[1], [0], [0], [1], [0, 0, 1, 1], [], []>} : vector<4x96xf32>, vector<96x64xf32>, vector<4x64xf32> -> vector<4x64xf32>
      %424 = vector.broadcast %2 : vector<1x64xf32> to vector<4x64xf32>
      %425 = arith.addf %423, %424 : vector<4x64xf32>
      %426 = math.absf %425 : vector<4x64xf32>
      %cst_152 = arith.constant 0.000000e+00 : f32
      %427 = vector.broadcast %cst_152 : f32 to vector<4x64xf32>
      %428 = arith.subf %427, %426 : vector<4x64xf32>
      %429 = math.exp %428 : vector<4x64xf32>
      %430 = math.log1p %429 : vector<4x64xf32>
      %cst_153 = arith.constant 0.000000e+00 : f32
      %431 = vector.broadcast %cst_153 : f32 to vector<4x64xf32>
      %432 = arith.maximumf %425, %431 : vector<4x64xf32>
      %433 = arith.addf %430, %432 : vector<4x64xf32>
      %cst_154 = arith.constant dense<0.000000e+00> : vector<4x8xf32>
      %434 = tpu.matmul %433, %3, %cst_154 {dimension_numbers = #tpu.dot_dimension_numbers<[1], [0], [0], [1], [0, 0, 1, 1], [], []>} : vector<4x64xf32>, vector<64x8xf32>, vector<4x8xf32> -> vector<4x8xf32>
      %435 = vector.broadcast %4 : vector<1x8xf32> to vector<4x8xf32>
      %436 = arith.addf %434, %435 : vector<4x8xf32>
      %437 = vector.extract_strided_slice %436 {offsets = [0, 0], sizes = [4, 4], strides = [1, 1]} : vector<4x8xf32> to vector<4x4xf32>
      %438 = vector.extract_strided_slice %436 {offsets = [0, 4], sizes = [4, 4], strides = [1, 1]} : vector<4x8xf32> to vector<4x4xf32>
      %439 = vector.extract_strided_slice %422 {offsets = [0, 32], sizes = [4, 32], strides = [1, 1]} : vector<4x96xf32> to vector<4x32xf32>
      %cst_155 = arith.constant dense<0.000000e+00> : vector<4x4xf32>
      %440 = tpu.matmul %439, %5, %cst_155 {dimension_numbers = #tpu.dot_dimension_numbers<[1], [0], [0], [1], [0, 0, 1, 1], [], []>} : vector<4x32xf32>, vector<32x4xf32>, vector<4x4xf32> -> vector<4x4xf32>
      %441 = vector.broadcast %6 : vector<1x4xf32> to vector<4x4xf32>
      %442 = arith.addf %440, %441 : vector<4x4xf32>
      %cst_156 = arith.constant 0.000000e+00 : f32
      %443 = vector.broadcast %cst_156 : f32 to vector<4x4xf32>
      %444 = arith.subf %443, %442 : vector<4x4xf32>
      %445 = math.exp %444 : vector<4x4xf32>
      %cst_157 = arith.constant 1.000000e+00 : f32
      %446 = vector.broadcast %cst_157 : f32 to vector<4x4xf32>
      %447 = arith.addf %446, %445 : vector<4x4xf32>
      %cst_158 = arith.constant 1.000000e+00 : f32
      %448 = vector.broadcast %cst_158 : f32 to vector<4x4xf32>
      %449 = arith.divf %448, %447 : vector<4x4xf32>
      %450 = arith.index_cast %409 : i32 to index
      %c0_159 = arith.constant 0 : index
      %c0_160 = arith.constant 0 : index
      %451 = vector.load %arg4[%450, %c0_159, %c0_160] : memref<88x4x4xf32, #tpu.memory_space<vmem>>, vector<1x4x4xf32>
      %452 = vector.shape_cast %451 : vector<1x4x4xf32> to vector<4x4xf32>
      %453 = arith.subf %438, %437 : vector<4x4xf32>
      %454 = arith.mulf %452, %453 : vector<4x4xf32>
      %455 = tpu.reciprocal %449 {approx = true} : vector<4x4xf32> -> vector<4x4xf32>
      %456 = arith.mulf %454, %455 : vector<4x4xf32>
      %457 = arith.mulf %456, %456 : vector<4x4xf32>
      %cst_161 = arith.constant dense<0.000000e+00> : vector<4xf32>
      %458 = vector.multi_reduction <add>, %457, %cst_161 [1] : vector<4x4xf32> to vector<4xf32>
      %459 = vector.shape_cast %458 : vector<4xf32> to vector<4x1xf32>
      %cst_162 = arith.constant 5.000000e-03 : f32
      %460 = vector.broadcast %cst_162 : f32 to vector<4x1xf32>
      %461 = arith.mulf %460, %459 : vector<4x1xf32>
      %462 = arith.addf %396, %461 : vector<4x1xf32>
      %463 = arith.addf %437, %454 : vector<4x4xf32>
      %cst_163 = arith.constant 0.00999999977 : f32
      %464 = vector.broadcast %cst_163 : f32 to vector<4x4xf32>
      %465 = arith.mulf %463, %464 : vector<4x4xf32>
      %466 = arith.addf %407, %465 : vector<4x4xf32>
      %467 = arith.index_cast %409 : i32 to index
      %c0_164 = arith.constant 0 : index
      %c0_165 = arith.constant 0 : index
      %468 = vector.load %arg3[%467, %c0_164, %c0_165] : memref<88x4x4xf32, #tpu.memory_space<vmem>>, vector<1x4x4xf32>
      %469 = vector.shape_cast %468 : vector<1x4x4xf32> to vector<4x4xf32>
      %cst_166 = arith.constant 1.000000e-01 : f32
      %470 = vector.broadcast %cst_166 : f32 to vector<4x4xf32>
      %471 = arith.mulf %470, %469 : vector<4x4xf32>
      %472 = arith.mulf %449, %471 : vector<4x4xf32>
      %473 = arith.addf %466, %472 : vector<4x4xf32>
      %c8_i32_167 = arith.constant 8 : i32
      %474 = arith.muli %arg8, %c8_i32_167 : i32
      %c7_i32 = arith.constant 7 : i32
      %475 = arith.addi %474, %c7_i32 : i32
      %cst_168 = arith.constant dense<0.000000e+00> : vector<4x96xf32>
      %476 = tpu.matmul %473, %0, %cst_168 {dimension_numbers = #tpu.dot_dimension_numbers<[1], [0], [0], [1], [0, 0, 1, 1], [], []>} : vector<4x4xf32>, vector<4x96xf32>, vector<4x96xf32> -> vector<4x96xf32>
      %477 = arith.index_cast %475 : i32 to index
      %c0_169 = arith.constant 0 : index
      %c0_170 = arith.constant 0 : index
      %478 = vector.load %arg2[%477, %c0_169, %c0_170] : memref<88x4x96xf32, #tpu.memory_space<vmem>>, vector<1x4x96xf32>
      %479 = vector.shape_cast %478 : vector<1x4x96xf32> to vector<4x96xf32>
      %480 = arith.addf %476, %479 : vector<4x96xf32>
      %481 = math.absf %480 : vector<4x96xf32>
      %cst_171 = arith.constant 0.000000e+00 : f32
      %482 = vector.broadcast %cst_171 : f32 to vector<4x96xf32>
      %483 = arith.subf %482, %481 : vector<4x96xf32>
      %484 = math.exp %483 : vector<4x96xf32>
      %485 = math.log1p %484 : vector<4x96xf32>
      %cst_172 = arith.constant 0.000000e+00 : f32
      %486 = vector.broadcast %cst_172 : f32 to vector<4x96xf32>
      %487 = arith.maximumf %480, %486 : vector<4x96xf32>
      %488 = arith.addf %485, %487 : vector<4x96xf32>
      %cst_173 = arith.constant dense<0.000000e+00> : vector<4x64xf32>
      %489 = tpu.matmul %488, %1, %cst_173 {dimension_numbers = #tpu.dot_dimension_numbers<[1], [0], [0], [1], [0, 0, 1, 1], [], []>} : vector<4x96xf32>, vector<96x64xf32>, vector<4x64xf32> -> vector<4x64xf32>
      %490 = vector.broadcast %2 : vector<1x64xf32> to vector<4x64xf32>
      %491 = arith.addf %489, %490 : vector<4x64xf32>
      %492 = math.absf %491 : vector<4x64xf32>
      %cst_174 = arith.constant 0.000000e+00 : f32
      %493 = vector.broadcast %cst_174 : f32 to vector<4x64xf32>
      %494 = arith.subf %493, %492 : vector<4x64xf32>
      %495 = math.exp %494 : vector<4x64xf32>
      %496 = math.log1p %495 : vector<4x64xf32>
      %cst_175 = arith.constant 0.000000e+00 : f32
      %497 = vector.broadcast %cst_175 : f32 to vector<4x64xf32>
      %498 = arith.maximumf %491, %497 : vector<4x64xf32>
      %499 = arith.addf %496, %498 : vector<4x64xf32>
      %cst_176 = arith.constant dense<0.000000e+00> : vector<4x8xf32>
      %500 = tpu.matmul %499, %3, %cst_176 {dimension_numbers = #tpu.dot_dimension_numbers<[1], [0], [0], [1], [0, 0, 1, 1], [], []>} : vector<4x64xf32>, vector<64x8xf32>, vector<4x8xf32> -> vector<4x8xf32>
      %501 = vector.broadcast %4 : vector<1x8xf32> to vector<4x8xf32>
      %502 = arith.addf %500, %501 : vector<4x8xf32>
      %503 = vector.extract_strided_slice %502 {offsets = [0, 0], sizes = [4, 4], strides = [1, 1]} : vector<4x8xf32> to vector<4x4xf32>
      %504 = vector.extract_strided_slice %502 {offsets = [0, 4], sizes = [4, 4], strides = [1, 1]} : vector<4x8xf32> to vector<4x4xf32>
      %505 = vector.extract_strided_slice %488 {offsets = [0, 32], sizes = [4, 32], strides = [1, 1]} : vector<4x96xf32> to vector<4x32xf32>
      %cst_177 = arith.constant dense<0.000000e+00> : vector<4x4xf32>
      %506 = tpu.matmul %505, %5, %cst_177 {dimension_numbers = #tpu.dot_dimension_numbers<[1], [0], [0], [1], [0, 0, 1, 1], [], []>} : vector<4x32xf32>, vector<32x4xf32>, vector<4x4xf32> -> vector<4x4xf32>
      %507 = vector.broadcast %6 : vector<1x4xf32> to vector<4x4xf32>
      %508 = arith.addf %506, %507 : vector<4x4xf32>
      %cst_178 = arith.constant 0.000000e+00 : f32
      %509 = vector.broadcast %cst_178 : f32 to vector<4x4xf32>
      %510 = arith.subf %509, %508 : vector<4x4xf32>
      %511 = math.exp %510 : vector<4x4xf32>
      %cst_179 = arith.constant 1.000000e+00 : f32
      %512 = vector.broadcast %cst_179 : f32 to vector<4x4xf32>
      %513 = arith.addf %512, %511 : vector<4x4xf32>
      %cst_180 = arith.constant 1.000000e+00 : f32
      %514 = vector.broadcast %cst_180 : f32 to vector<4x4xf32>
      %515 = arith.divf %514, %513 : vector<4x4xf32>
      %516 = arith.index_cast %475 : i32 to index
      %c0_181 = arith.constant 0 : index
      %c0_182 = arith.constant 0 : index
      %517 = vector.load %arg4[%516, %c0_181, %c0_182] : memref<88x4x4xf32, #tpu.memory_space<vmem>>, vector<1x4x4xf32>
      %518 = vector.shape_cast %517 : vector<1x4x4xf32> to vector<4x4xf32>
      %519 = arith.subf %504, %503 : vector<4x4xf32>
      %520 = arith.mulf %518, %519 : vector<4x4xf32>
      %521 = tpu.reciprocal %515 {approx = true} : vector<4x4xf32> -> vector<4x4xf32>
      %522 = arith.mulf %520, %521 : vector<4x4xf32>
      %523 = arith.mulf %522, %522 : vector<4x4xf32>
      %cst_183 = arith.constant dense<0.000000e+00> : vector<4xf32>
      %524 = vector.multi_reduction <add>, %523, %cst_183 [1] : vector<4x4xf32> to vector<4xf32>
      %525 = vector.shape_cast %524 : vector<4xf32> to vector<4x1xf32>
      %cst_184 = arith.constant 5.000000e-03 : f32
      %526 = vector.broadcast %cst_184 : f32 to vector<4x1xf32>
      %527 = arith.mulf %526, %525 : vector<4x1xf32>
      %528 = arith.addf %462, %527 : vector<4x1xf32>
      %529 = arith.addf %503, %520 : vector<4x4xf32>
      %cst_185 = arith.constant 0.00999999977 : f32
      %530 = vector.broadcast %cst_185 : f32 to vector<4x4xf32>
      %531 = arith.mulf %529, %530 : vector<4x4xf32>
      %532 = arith.addf %473, %531 : vector<4x4xf32>
      %533 = arith.index_cast %475 : i32 to index
      %c0_186 = arith.constant 0 : index
      %c0_187 = arith.constant 0 : index
      %534 = vector.load %arg3[%533, %c0_186, %c0_187] : memref<88x4x4xf32, #tpu.memory_space<vmem>>, vector<1x4x4xf32>
      %535 = vector.shape_cast %534 : vector<1x4x4xf32> to vector<4x4xf32>
      %cst_188 = arith.constant 1.000000e-01 : f32
      %536 = vector.broadcast %cst_188 : f32 to vector<4x4xf32>
      %537 = arith.mulf %536, %535 : vector<4x4xf32>
      %538 = arith.mulf %515, %537 : vector<4x4xf32>
      %539 = arith.addf %532, %538 : vector<4x4xf32>
      %540 = arith.index_cast %arg8 : i32 to index
      %c0_189 = arith.constant 0 : index
      %c0_190 = arith.constant 0 : index
      %541 = vector.load %arg6[%540, %c0_189, %c0_190] : memref<11x4x4xf32, #tpu.memory_space<vmem>>, vector<1x4x4xf32>
      %542 = vector.shape_cast %541 : vector<1x4x4xf32> to vector<4x4xf32>
      %543 = vector.shape_cast %539 : vector<4x4xf32> to vector<1x4x4xf32>
      tpu.vector_store %arg6[%540, %c0_189, %c0_190], %543 {strides = array<i32>} : memref<11x4x4xf32, #tpu.memory_space<vmem>>, vector<1x4x4xf32>,
      scf.yield %539, %528 : vector<4x4xf32>, vector<4x1xf32>
    }
    %c11_i32_9 = arith.constant 11 : i32
    %c0_10 = arith.constant 0 : index
    %c0_11 = arith.constant 0 : index
    %11 = vector.load %arg7[%c0_10, %c0_11] : memref<4x1xf32, #tpu.memory_space<vmem>>, vector<4x1xf32>
    tpu.vector_store %arg7[%c0_10, %c0_11], %10#1 {strides = array<i32>} : memref<4x1xf32, #tpu.memory_space<vmem>>, vector<4x1xf32>,
    return
  }
  func.func @transform_0(%arg0: i32) -> (i32, i32) {
    %c0_i32 = arith.constant 0 : i32
    %c0_i32_0 = arith.constant 0 : i32
    %c0_i32_1 = arith.constant 0 : i32
    return %c0_i32, %c0_i32_0 : i32, i32
  }
  func.func @transform_1(%arg0: i32) -> (i32, i32, i32) {
    %c0_i32 = arith.constant 0 : i32
    %c0_i32_0 = arith.constant 0 : i32
    %c0_i32_1 = arith.constant 0 : i32
    %c0_i32_2 = arith.constant 0 : i32
    return %c0_i32, %c0_i32_0, %c0_i32_1 : i32, i32, i32
  }
  func.func @transform_2(%arg0: i32) -> (i32, i32, i32) {
    %c0_i32 = arith.constant 0 : i32
    %c0_i32_0 = arith.constant 0 : i32
    %c0_i32_1 = arith.constant 0 : i32
    %c0_i32_2 = arith.constant 0 : i32
    return %c0_i32, %c0_i32_0, %c0_i32_1 : i32, i32, i32
  }
  func.func @transform_3(%arg0: i32) -> (i32, i32, i32) {
    %c0_i32 = arith.constant 0 : i32
    %c0_i32_0 = arith.constant 0 : i32
    %c0_i32_1 = arith.constant 0 : i32
    %c0_i32_2 = arith.constant 0 : i32
    return %c0_i32, %c0_i32_0, %c0_i32_1 : i32, i32, i32
  }
  func.func @transform_4(%arg0: i32) -> (i32, i32) {
    %c0_i32 = arith.constant 0 : i32
    %c0_i32_0 = arith.constant 0 : i32
    %c0_i32_1 = arith.constant 0 : i32
    return %c0_i32, %c0_i32_0 : i32, i32
  }
  func.func @transform_5(%arg0: i32) -> (i32, i32, i32) {
    %c0_i32 = arith.constant 0 : i32
    %c0_i32_0 = arith.constant 0 : i32
    %c0_i32_1 = arith.constant 0 : i32
    %c0_i32_2 = arith.constant 0 : i32
    return %c0_i32, %c0_i32_0, %c0_i32_1 : i32, i32, i32
  }
  func.func @transform_6(%arg0: i32) -> (i32, i32) {
    %c0_i32 = arith.constant 0 : i32
    %c0_i32_0 = arith.constant 0 : i32
    %c0_i32_1 = arith.constant 0 : i32
    return %c0_i32, %c0_i32_0 : i32, i32
  }
}

</mosaic_0001>

<bundles_post_ra>
// kernel: tpu_custom_call.1
= control target key start
LH: loop header
LB: loop body
LE: loop exit
PB: predicated region body
PF: predicated region fallthrough
CT: control target
= control target key end

     0   :  { %v4291_v29 = vmov 0.0   ;;  %s4295_s7 = smov 0   ;;  %s4985_s1 = inlined_call_operand.vmem [shape: f32[88,4,96], index: 1, kind: input, shape index: {}]   ;;  %s4986_s2 = inlined_call_operand.vmem [shape: f32[88,4,4], index: 2, kind: input, shape index: {}]   ;;  %s4987_s3 = inlined_call_operand.vmem [shape: f32[88,4,4], index: 3, kind: input, shape index: {}]   ;;  %s4988_s4 = inlined_call_operand.vmem [shape: f32[224,128], index: 4, kind: input, shape index: {}]   ;;  %s4989_s5 = inlined_call_operand.vmem [shape: f32[11,4,4], index: 5, kind: output, shape index: {0}]   ;;  %s4990_s6 = inlined_call_operand.vmem [shape: f32[4,1], index: 6, kind: output, shape index: {1}]   ;;  %s4991_s0 = inlined_call_operand.vmem [shape: f32[4,4], index: 0, kind: input, shape index: {}]  }
   0x1   :  { %v4151_v0 = vld [vmem:[%s4988_s4] sm:$0xf]  ;;  %v4156_v1 = vld [vmem:[%s4988_s4 + $0x8] sm:$0xff]  ;;  %v4161_v2 = vld [vmem:[%s4988_s4 + $0x10] sm:$0xff] }
   0x2   :  { %v4166_v3 = vld [vmem:[%s4988_s4 + $0x18] sm:$0xff]  ;;  %v4171_v4 = vld [vmem:[%s4988_s4 + $0x20] sm:$0xff]  ;;  %v4176_v5 = vld [vmem:[%s4988_s4 + $0x28] sm:$0xff] }
   0x3   :  { %v4181_v6 = vld [vmem:[%s4988_s4 + $0x30] sm:$0xff]  ;;  %v4186_v7 = vld [vmem:[%s4988_s4 + $0x38] sm:$0xff]  ;;  %v4191_v8 = vld [vmem:[%s4988_s4 + $0x40] sm:$0xff] }
   0x4   :  { %v4196_v9 = vld [vmem:[%s4988_s4 + $0x48] sm:$0xff]  ;;  %v4201_v10 = vld [vmem:[%s4988_s4 + $0x50] sm:$0xff]  ;;  %v4206_v11 = vld [vmem:[%s4988_s4 + $0x58] sm:$0xff] }
   0x5   :  { %v4211_v12 = vld [vmem:[%s4988_s4 + $0x60] sm:$0xff]  ;;  %v4216_v13 = vld [vmem:[%s4988_s4 + $0x68] ss:$0 sm:$0xff]  ;;  %v4221_v14 = vld [vmem:[%s4988_s4 + $0x70] sm:$0xff] }
   0x6   :  { %v4226_v15 = vld [vmem:[%s4988_s4 + $0x78] sm:$0xff]  ;;  %v4231_v16 = vld [vmem:[%s4988_s4 + $0x80] sm:$0xff]  ;;  %v4236_v17 = vld [vmem:[%s4988_s4 + $0x88] sm:$0xff] }
   0x7   :  { %v4241_v18 = vld [vmem:[%s4988_s4 + $0x90] sm:$0xff]  ;;  %v4246_v19 = vld [vmem:[%s4988_s4 + $0x98] sm:$0xff]  ;;  %v4251_v20 = vld [vmem:[%s4988_s4 + $0xa0] sm:$0xff] }
   0x8   :  { %v4256_v21 = vld [vmem:[%s4988_s4 + $0xa8] sm:$0xff]  ;;  %v4261_v22 = vld [vmem:[%s4988_s4 + $0xb0] ss:$0 sm:$0xff]  ;;  %v4266_v23 = vld [vmem:[%s4988_s4 + $0xb8] sm:$0xff] }
   0x9   :  { %v4271_v24 = vld [vmem:[%s4988_s4 + $0xc0] sm:$0xff]  ;;  %v4276_v25 = vld [vmem:[%s4988_s4 + $0xc8] sm:$0xff]  ;;  %v4281_v26 = vld [vmem:[%s4988_s4 + $0xd0] sm:$0xff] }
   0xa   :  { %v4286_v27 = vld [vmem:[%s4988_s4 + $0xd8] ss:$0 sm:$0xff]  ;;  %v50_v28 = vld [vmem:[%s4991_s0] sm:$0xf]  }
   0xb LB: > { %vm67_vm0 = vcmask 1043456   ;;  %v4108_v30 = vmov 0.0   ;;  %vm4109_vm1 = vmmov 0   ;;  %vm63_vm2 = vcmask 31744   ;;  %s4360_s0 = sshll.u32 %s4106_s7, 5  ;;  %s4110_s10 = smov 96   ;;  %s4106_s7 = sphi %s4295_s7, %s56_s7   ;;  %v4102_v28 = vphi %v50_v28, %v2967_v28   ;;  %v4098_v29 = vphi %v4291_v29, %v4992_v29  }
   0xc   : > { %3447 = vmatprep.subr.mxu0 %v4108_v30  ;;  %3449 = vmatprep.mubr.msk.f32.mxu0 %vm4109_vm1, %v4108_v30  ;;  %s4366_s9 = scalar_lea.vmem %s4985_s1, %s4360_s0  ;;  %vm160_vm4 = vcmask 785408   ;;  %vm253_vm6 = vcmask 523264   ;;  %vm333_vm7 = vcmask 261120   ;;  %s4111_s11 = smov 4  }
   0xd   : > { %3448 = vmatpush3.msk.msra.mxu0 %vm67_vm0, %v4151_v0  ;;  %3452 = vmatprep.subr.mxu1 %v4108_v30  ;;  %v62_v31 = vld [vmem:[%s4366_s9] sm:$0xf]  ;;  %s4112_s12 = smov 124   ;;  %s4423_s15 = scalar_lea.vmem %s4987_s3, %s4360_s0 }
   0xe   : > { %3450 = vmatmul.mubr.msk.f32.vlgmr.msra.gmra.mxu0 %vm63_vm2, %v4102_v28  ;;  %3453 = vmatpush3.msra.mxu1 %v4211_v12  ;;  %s4429_s18 = scalar_lea.vmem %s4986_s2, %s4360_s0  ;;  %s3192_s19 = sshll.u32 %s4106_s7, 2 }
   0xf   : > { %3454 = vmatprep.subr.mxu1 %v4108_v30  ;;  %3476 = vmatprep.mubr.msk.f32.mxu1 %vm4109_vm1, %v4108_v30  ;;  %s2969_s22 = scalar_lea.vmem %s4989_s5, %s3192_s19  ;;  %s56_s7 = sadd.s32 1, %s4106_s7  }
  0x10   : > { %3455 = vmatpush3.msra.mxu1 %v4206_v11  ;;  %3479 = vmatprep.subr.mxu0 %v4108_v30  ;;  %p53_p0 = scmp.ge.s32.totalorder %s56_s7, 11  }
  0x11   : > { %3456 = vmatprep.subr.mxu1 %v4108_v30  ;;  %3480 = vmatpush3.msra.mxu0 %v4256_v21 }
  0x12   : > { %3457 = vmatpush3.msra.mxu1 %v4201_v10  ;;  %3481 = vmatprep.subr.mxu0 %v4108_v30 }
  0x13   : > { %3458 = vmatprep.subr.mxu1 %v4108_v30  ;;  %3482 = vmatpush3.msra.mxu0 %v4251_v20 }
  0x14   : > { %3459 = vmatpush3.msra.mxu1 %v4196_v9  ;;  %3483 = vmatprep.subr.mxu0 %v4108_v30 }
  0x15   : > { %3460 = vmatprep.subr.mxu1 %v4108_v30  ;;  %3484 = vmatpush3.msra.mxu0 %v4246_v19 }
  0x16   : > { %3461 = vmatpush3.msra.mxu1 %v4191_v8  ;;  %3485 = vmatprep.subr.mxu0 %v4108_v30 }
  0x17   : > { %3462 = vmatprep.subr.mxu1 %v4108_v30  ;;  %3486 = vmatpush3.msra.mxu0 %v4241_v18 }
  0x18   : > { %3463 = vmatpush3.msra.mxu1 %v4186_v7  ;;  %3487 = vmatprep.subr.mxu0 %v4108_v30 }
  0x19   : > { %3464 = vmatprep.subr.mxu1 %v4108_v30  ;;  %3488 = vmatpush3.msra.mxu0 %v4236_v17 }
  0x1a   : > { %3465 = vmatpush3.msra.mxu1 %v4181_v6  ;;  %3489 = vmatprep.subr.mxu0 %v4108_v30 }
  0x1b   : > { %3466 = vmatprep.subr.mxu1 %v4108_v30  ;;  %3490 = vmatpush3.msra.mxu0 %v4231_v16 }
  0x1c   : > { %3467 = vmatpush3.msra.mxu1 %v4176_v5  ;;  %3491 = vmatprep.subr.mxu0 %v4108_v30 }
  0x1d   : > { %3468 = vmatprep.subr.mxu1 %v4108_v30  ;;  %3492 = vmatpush3.msra.mxu0 %v4226_v15 }
  0x1e   : > { %3469 = vmatpush3.msra.mxu1 %v4171_v4  ;;  %3493 = vmatprep.subr.mxu0 %v4108_v30 }
  0x1f   : > { %3470 = vmatprep.subr.mxu1 %v4108_v30  ;;  %3494 = vmatpush3.msra.mxu0 %v4221_v14 }
  0x20   : > { %3471 = vmatpush3.msra.mxu1 %v4166_v3  ;;  %3495 = vmatprep.mubr.msk.f32.mxu0 %vm4109_vm1, %v4108_v30 }
  0x21   : > { %3472 = vmatprep.subr.mxu1 %v4108_v30  ;;  %3498 = vmatprep.subr.mxu0 %v4108_v30 }
  0x22   : > { %3473 = vmatpush3.msra.mxu1 %v4161_v2 }
  0x23   : > { %3474 = vmatprep.subr.mxu1 %v4108_v30 }
  0x24   : > { %3475 = vmatpush3.msra.mxu1 %v4156_v1 }
  0x25   : > { %3509 = vmatprep.subr.mxu1 %v4108_v30 }
  0xce   : > { %v137_v32 = vpop.f32.mrf.mxu0 }
  0xcf   : > { %v138_v33 = vadd.f32 %v137_v32, %v62_v31 }
  0xd0   : > { %v3451_v34 = vpop.f32.mrf.mxu0 }
  0xd1   : > { %v141_v35 = vand.u32 2147483647, %v138_v33  ;;  %v154_v46 = vmax.f32 %v138_v33, 0.0 }
  0xd3   : > { %v142_v36 = vsub.f32 0.0, %v141_v35 }
  0xd5   : > { %v143_v37 = vmul.f32 1.442695, %v142_v36 }
  0xd7   : > { %3972 = vpow2.f32 %v143_v37 }
  0xe4   : > { %v3973_v38 = vpop.eup %3972 }
  0xe5   : > { %v145_v39 = vadd.f32 1.0, %v3973_v38  ;;  %v148_v40 = vmul.f32 -0.5, %v3973_v38  ;;  %v151_v42 = vand.u32 2147483647, %v3973_v38 }
  0xe7   : > { %3974 = vlog2.f32 %v145_v39  ;;  %v149_v41 = vadd.f32 1.0, %v148_v40  ;;  %vm152_vm3 = vcmp.lt.f32.partialorder %v151_v42, 0.0004427343 }
  0xe9   : > { %v150_v45 = vmul.f32 %v3973_v38, %v149_v41 }
  0xf4   : > { %v3975_v43 = vpop.eup %3974 }
  0xf5   : > { %v147_v44 = vmul.f32 0.6931472, %v3975_v43 }
  0xf7   : > { %v153_v47 = vsel %vm152_vm3, %v150_v45, %v147_v44 }
  0xf8   : > { %v155_v48 = vadd.f32 %v154_v46, %v153_v47  ;;  %v413_v47 = vld [vmem:[%s4423_s15] sm:$0xf] }
  0xfa   : > { %331 = vrot.lane.b32.xlu0 %v155_v48, %s4110_s10  ;;  %3477 = vmatmul.mubr.msk.f32.vlgmr.msra.gmra.mxu1 %vm160_vm4, %v155_v48  ;;  %v437_v48 = vld [vmem:[%s4429_s18] sm:$0xf] }
  0xfb   : > { %3510 = vmatpush3.msk.msra.mxu1 %vm67_vm0, %v4151_v0  ;;  %3511 = vmatprep.mubr.msk.f32.mxu1 %vm4109_vm1, %v4108_v30 }
  0xfc   : > { %3541 = vmatprep.subr.mxu1 %v4108_v30 }
 0x16c   : > { %v332_v33 = vpop.permute.xlu0 %331 }
 0x1ba   : > { %v230_v49 = vpop.f32.mrf.mxu1 }
 0x1bb   : > { %v231_v50 = vadd.f32 %v4216_v13, %v230_v49 }
 0x1bc   : > { %v3478_v51 = vpop.f32.mrf.mxu1 }
 0x1bd   : > { %v234_v52 = vand.u32 2147483647, %v231_v50  ;;  %v247_v63 = vmax.f32 %v231_v50, 0.0 }
 0x1bf   : > { %v235_v53 = vsub.f32 0.0, %v234_v52  ;;  %v438_v52 = vmul.f32 0.1, %v437_v48 }
 0x1c1   : > { %v236_v54 = vmul.f32 1.442695, %v235_v53 }
 0x1c3   : > { %3976 = vpow2.f32 %v236_v54 }
 0x1d0   : > { %v3977_v55 = vpop.eup %3976 }
 0x1d1   : > { %v238_v56 = vadd.f32 1.0, %v3977_v55  ;;  %v241_v57 = vmul.f32 -0.5, %v3977_v55  ;;  %v244_v59 = vand.u32 2147483647, %v3977_v55 }
 0x1d3   : > { %3978 = vlog2.f32 %v238_v56  ;;  %v242_v58 = vadd.f32 1.0, %v241_v57  ;;  %vm245_vm5 = vcmp.lt.f32.partialorder %v244_v59, 0.0004427343 }
 0x1d5   : > { %v243_v62 = vmul.f32 %v3977_v55, %v242_v58 }
 0x1e0   : > { %v3979_v60 = vpop.eup %3978 }
 0x1e1   : > { %v240_v61 = vmul.f32 0.6931472, %v3979_v60 }
 0x1e3   : > { %v246_v31 = vsel %vm245_vm5, %v243_v62, %v240_v61 }
 0x1e4   : > { %v248_v32 = vadd.f32 %v247_v63, %v246_v31 }
 0x1e6   : > { %3496 = vmatmul.mubr.msk.f32.vlgmr.msra.gmra.mxu0 %vm253_vm6, %v248_v32 }
 0x1e7   : > { %3499 = vmatpush3.msra.mxu0 %v4281_v26  ;;  %3506 = vmatprep.mubr.msk.f32.mxu0 %vm4109_vm1, %v4108_v30 }
 0x1e8   : > { %3500 = vmatprep.subr.mxu0 %v4108_v30 }
 0x1e9   : > { %3501 = vmatpush3.msra.mxu0 %v4276_v25 }
 0x1ea   : > { %3502 = vmatprep.subr.mxu0 %v4108_v30 }
 0x1eb   : > { %3503 = vmatpush3.msra.mxu0 %v4271_v24 }
 0x1ec   : > { %3504 = vmatprep.subr.mxu0 %v4108_v30 }
 0x1ed   : > { %3505 = vmatpush3.msra.mxu0 %v4266_v23 }
 0x1ee   : > { %3507 = vmatmul.mubr.msk.f32.vlgmr.msra.gmra.mxu0 %vm333_vm7, %v332_v33  ;;  %3514 = vmatprep.subr.mxu0 %v4108_v30 }
 0x1ef   : > { %3515 = vmatpush3.msra.mxu0 %v4211_v12  ;;  %3538 = vmatprep.mubr.msk.f32.mxu0 %vm4109_vm1, %v4108_v30 }
 0x1f0   : > { %3516 = vmatprep.subr.mxu0 %v4108_v30 }
 0x1f1   : > { %3517 = vmatpush3.msra.mxu0 %v4206_v11 }
 0x1f2   : > { %3518 = vmatprep.subr.mxu0 %v4108_v30 }
 0x1f3   : > { %3519 = vmatpush3.msra.mxu0 %v4201_v10 }
 0x1f4   : > { %3520 = vmatprep.subr.mxu0 %v4108_v30 }
 0x1f5   : > { %3521 = vmatpush3.msra.mxu0 %v4196_v9 }
 0x1f6   : > { %3522 = vmatprep.subr.mxu0 %v4108_v30 }
 0x1f7   : > { %3523 = vmatpush3.msra.mxu0 %v4191_v8 }
 0x1f8   : > { %3524 = vmatprep.subr.mxu0 %v4108_v30 }
 0x1f9   : > { %3525 = vmatpush3.msra.mxu0 %v4186_v7 }
 0x1fa   : > { %3526 = vmatprep.subr.mxu0 %v4108_v30 }
 0x1fb   : > { %3527 = vmatpush3.msra.mxu0 %v4181_v6 }
 0x1fc   : > { %3528 = vmatprep.subr.mxu0 %v4108_v30 }
 0x1fd   : > { %3529 = vmatpush3.msra.mxu0 %v4176_v5 }
 0x1fe   : > { %3530 = vmatprep.subr.mxu0 %v4108_v30 }
 0x1ff   : > { %3531 = vmatpush3.msra.mxu0 %v4171_v4 }
 0x200   : > { %3532 = vmatprep.subr.mxu0 %v4108_v30 }
 0x201   : > { %3533 = vmatpush3.msra.mxu0 %v4166_v3 }
 0x202   : > { %3534 = vmatprep.subr.mxu0 %v4108_v30 }
 0x203   : > { %3535 = vmatpush3.msra.mxu0 %v4161_v2 }
 0x204   : > { %3536 = vmatprep.subr.mxu0 %v4108_v30 }
 0x205   : > { %3537 = vmatpush3.msra.mxu0 %v4156_v1 }
 0x206   : > { %3571 = vmatprep.subr.mxu0 %v4108_v30 }
 0x2a6   : > { %v323_v34 = vpop.f32.mrf.mxu0 }
 0x2a7   : > { %v324_v35 = vadd.f32 %v4261_v22, %v323_v34 }
 0x2a8   : > { %v3497_v36 = vpop.f32.mrf.mxu0 }
 0x2a9   : > { %415 = vrot.lane.b32.xlu0 %v324_v35, %s4111_s11 }
 0x2ae   : > { %v402_v37 = vpop.f32.mrf.mxu0 }
 0x2af   : > { %v403_v41 = vadd.f32 %v4286_v27, %v402_v37 }
 0x2b0   : > { %v3508_v38 = vpop.f32.mrf.mxu0 }
 0x2b1   : > { %v406_v42 = vsub.f32 0.0, %v403_v41 }
 0x2b3   : > { %v407_v43 = vmul.f32 1.442695, %v406_v42 }
 0x2b5   : > { %3980 = vpow2.f32 %v407_v43 }
 0x2c2   : > { %v3981_v44 = vpop.eup %3980 }
 0x2c3   : > { %v409_v45 = vadd.f32 1.0, %v3981_v44 }
 0x2c5   : > { %3982 = vrcp.f32 %v409_v45 }
 0x2d2   : > { %v3983_v46 = vpop.eup %3982 }
 0x2d3   : > { %3984 = vrcp.f32 %v3983_v46  ;;  %v439_v57 = vmul.f32 %v3983_v46, %v438_v52 }
 0x2e0   : > { %v3985_v51 = vpop.eup %3984 }
 0x31b   : > { %v416_v39 = vpop.permute.xlu0 %415 }
 0x31c   : > { %v418_v40 = vsub.f32 %v324_v35, %v416_v39 }
 0x31e   : > { %420 = vrot.lane.b32.xlu1 %v418_v40, %s4112_s12 }
 0x390   : > { %v421_v49 = vpop.permute.xlu1 %420 }
 0x391   : > { %v423_v50 = vmul.f32 %v421_v49, %v413_v47 }
 0x393   : > { %v4433_v53 = vmul.f32 %v3985_v51, %v423_v50  ;;  %v433_v54 = vadd.f32 %v423_v50, %v324_v35 }
 0x395   : > { %v434_v55 = vmul.f32 0.01, %v433_v54 }
 0x397   : > { %v435_v56 = vadd.f32 %v4102_v28, %v434_v55  ;;  %v3096_v28 = vld [vmem:[%s4366_s9 + $0x4] sm:$0xf] }
 0x399   : > { %v4436_v58 = vadd.f32 %v439_v57, %v435_v56 }
 0x39b   : > { %3512 = vmatmul.mubr.msk.f32.vlgmr.msra.gmra.mxu1 %vm63_vm2, %v4436_v58 }
 0x39c   : > { %3542 = vmatpush3.msra.mxu1 %v4256_v21  ;;  %3557 = vmatprep.mubr.msk.f32.mxu1 %vm4109_vm1, %v4108_v30 }
 0x39d   : > { %3543 = vmatprep.subr.mxu1 %v4108_v30 }
 0x39e   : > { %3544 = vmatpush3.msra.mxu1 %v4251_v20 }
 0x39f   : > { %3545 = vmatprep.subr.mxu1 %v4108_v30 }
 0x3a0   : > { %3546 = vmatpush3.msra.mxu1 %v4246_v19 }
 0x3a1   : > { %3547 = vmatprep.subr.mxu1 %v4108_v30 }
 0x3a2   : > { %3548 = vmatpush3.msra.mxu1 %v4241_v18 }
 0x3a3   : > { %3549 = vmatprep.subr.mxu1 %v4108_v30 }
 0x3a4   : > { %3550 = vmatpush3.msra.mxu1 %v4236_v17 }
 0x3a5   : > { %3551 = vmatprep.subr.mxu1 %v4108_v30 }
 0x3a6   : > { %3552 = vmatpush3.msra.mxu1 %v4231_v16 }
 0x3a7   : > { %3553 = vmatprep.subr.mxu1 %v4108_v30 }
 0x3a8   : > { %3554 = vmatpush3.msra.mxu1 %v4226_v15 }
 0x3a9   : > { %3555 = vmatprep.subr.mxu1 %v4108_v30 }
 0x3aa   : > { %3556 = vmatpush3.msra.mxu1 %v4221_v14 }
 0x3ab   : > { %3560 = vmatprep.subr.mxu1 %v4108_v30 }
 0x45b   : > { %v514_v59 = vpop.f32.mrf.mxu1 }
 0x45c   : > { %v515_v60 = vadd.f32 %v3096_v28, %v514_v59 }
 0x45d   : > { %v3513_v61 = vpop.f32.mrf.mxu1 }
 0x45e   : > { %v518_v62 = vand.u32 2147483647, %v515_v60  ;;  %v531_v40 = vmax.f32 %v515_v60, 0.0 }
 0x460   : > { %v519_v63 = vsub.f32 0.0, %v518_v62 }
 0x462   : > { %v520_v31 = vmul.f32 1.442695, %v519_v63 }
 0x464   : > { %3986 = vpow2.f32 %v520_v31 }
 0x471   : > { %v3987_v32 = vpop.eup %3986 }
 0x472   : > { %v522_v33 = vadd.f32 1.0, %v3987_v32  ;;  %v525_v34 = vmul.f32 -0.5, %v3987_v32  ;;  %v528_v36 = vand.u32 2147483647, %v3987_v32 }
 0x474   : > { %3988 = vlog2.f32 %v522_v33  ;;  %v526_v35 = vadd.f32 1.0, %v525_v34  ;;  %vm529_vm8 = vcmp.lt.f32.partialorder %v528_v36, 0.0004427343 }
 0x476   : > { %v527_v39 = vmul.f32 %v3987_v32, %v526_v35 }
 0x481   : > { %v3989_v37 = vpop.eup %3988 }
 0x482   : > { %v524_v38 = vmul.f32 0.6931472, %v3989_v37 }
 0x484   : > { %v530_v41 = vsel %vm529_vm8, %v527_v39, %v524_v38 }
 0x485   : > { %v532_v42 = vadd.f32 %v531_v40, %v530_v41 }
 0x487   : > { %694 = vrot.lane.b32.xlu1 %v532_v42, %s4110_s10  ;;  %3539 = vmatmul.mubr.msk.f32.vlgmr.msra.gmra.mxu0 %vm160_vm4, %v532_v42  ;;  %v3104_v42 = vld [vmem:[%s4423_s15 + $0x4] sm:$0xf] }
 0x488   : > { %3572 = vmatpush3.msk.msra.mxu0 %vm67_vm0, %v4151_v0  ;;  %3573 = vmatprep.mubr.msk.f32.mxu0 %vm4109_vm1, %v4108_v30 }
 0x489   : > { %3603 = vmatprep.subr.mxu0 %v4108_v30 }
 0x4f9   : > { %v695_v61 = vpop.permute.xlu1 %694 }
 0x547   : > { %v602_v43 = vpop.f32.mrf.mxu0 }
 0x548   : > { %v603_v44 = vadd.f32 %v4216_v13, %v602_v43  ;;  %v3107_v43 = vld [vmem:[%s4429_s18 + $0x4] sm:$0xf] }
 0x549   : > { %v3540_v45 = vpop.f32.mrf.mxu0 }
 0x54a   : > { %v606_v46 = vand.u32 2147483647, %v603_v44  ;;  %v619_v28 = vmax.f32 %v603_v44, 0.0 }
 0x54c   : > { %v607_v47 = vsub.f32 0.0, %v606_v46 }
 0x54e   : > { %v608_v48 = vmul.f32 1.442695, %v607_v47  ;;  %v799_v47 = vmul.f32 0.1, %v3107_v43 }
 0x550   : > { %3990 = vpow2.f32 %v608_v48 }
 0x55d   : > { %v3991_v49 = vpop.eup %3990 }
 0x55e   : > { %v610_v50 = vadd.f32 1.0, %v3991_v49  ;;  %v613_v51 = vmul.f32 -0.5, %v3991_v49  ;;  %v616_v54 = vand.u32 2147483647, %v3991_v49 }
 0x560   : > { %3992 = vlog2.f32 %v610_v50  ;;  %v614_v52 = vadd.f32 1.0, %v613_v51  ;;  %vm617_vm9 = vcmp.lt.f32.partialorder %v616_v54, 0.0004427343 }
 0x562   : > { %v615_v57 = vmul.f32 %v3991_v49, %v614_v52 }
 0x56d   : > { %v3993_v55 = vpop.eup %3992 }
 0x56e   : > { %v612_v56 = vmul.f32 0.6931472, %v3993_v55 }
 0x570   : > { %v618_v59 = vsel %vm617_vm9, %v615_v57, %v612_v56  ;;  %vm427_vm9 = vcmask 27648  }
 0x571   : > { %v620_v60 = vadd.f32 %v619_v28, %v618_v59 }
 0x573   : > { %3558 = vmatmul.mubr.msk.f32.vlgmr.msra.gmra.mxu1 %vm253_vm6, %v620_v60 }
 0x574   : > { %3561 = vmatpush3.msra.mxu1 %v4281_v26  ;;  %3568 = vmatprep.mubr.msk.f32.mxu1 %vm4109_vm1, %v4108_v30 }
 0x575   : > { %3562 = vmatprep.subr.mxu1 %v4108_v30 }
 0x576   : > { %3563 = vmatpush3.msra.mxu1 %v4276_v25 }
 0x577   : > { %3564 = vmatprep.subr.mxu1 %v4108_v30 }
 0x578   : > { %3565 = vmatpush3.msra.mxu1 %v4271_v24 }
 0x579   : > { %3566 = vmatprep.subr.mxu1 %v4108_v30 }
 0x57a   : > { %3567 = vmatpush3.msra.mxu1 %v4266_v23 }
 0x57b   : > { %3569 = vmatmul.mubr.msk.f32.vlgmr.msra.gmra.mxu1 %vm333_vm7, %v695_v61  ;;  %3576 = vmatprep.subr.mxu1 %v4108_v30 }
 0x57c   : > { %3577 = vmatpush3.msra.mxu1 %v4211_v12  ;;  %3600 = vmatprep.mubr.msk.f32.mxu1 %vm4109_vm1, %v4108_v30 }
 0x57d   : > { %3578 = vmatprep.subr.mxu1 %v4108_v30 }
 0x57e   : > { %3579 = vmatpush3.msra.mxu1 %v4206_v11 }
 0x57f   : > { %3580 = vmatprep.subr.mxu1 %v4108_v30 }
 0x580   : > { %3581 = vmatpush3.msra.mxu1 %v4201_v10 }
 0x581   : > { %3582 = vmatprep.subr.mxu1 %v4108_v30 }
 0x582   : > { %3583 = vmatpush3.msra.mxu1 %v4196_v9 }
 0x583   : > { %3584 = vmatprep.subr.mxu1 %v4108_v30 }
 0x584   : > { %3585 = vmatpush3.msra.mxu1 %v4191_v8 }
 0x585   : > { %3586 = vmatprep.subr.mxu1 %v4108_v30 }
 0x586   : > { %3587 = vmatpush3.msra.mxu1 %v4186_v7 }
 0x587   : > { %3588 = vmatprep.subr.mxu1 %v4108_v30 }
 0x588   : > { %3589 = vmatpush3.msra.mxu1 %v4181_v6 }
 0x589   : > { %3590 = vmatprep.subr.mxu1 %v4108_v30 }
 0x58a   : > { %3591 = vmatpush3.msra.mxu1 %v4176_v5 }
 0x58b   : > { %3592 = vmatprep.subr.mxu1 %v4108_v30 }
 0x58c   : > { %3593 = vmatpush3.msra.mxu1 %v4171_v4 }
 0x58d   : > { %3594 = vmatprep.subr.mxu1 %v4108_v30 }
 0x58e   : > { %3595 = vmatpush3.msra.mxu1 %v4166_v3 }
 0x58f   : > { %3596 = vmatprep.subr.mxu1 %v4108_v30 }
 0x590   : > { %3597 = vmatpush3.msra.mxu1 %v4161_v2 }
 0x591   : > { %3598 = vmatprep.subr.mxu1 %v4108_v30 }
 0x592   : > { %3599 = vmatpush3.msra.mxu1 %v4156_v1 }
 0x593   : > { %3633 = vmatprep.subr.mxu1 %v4108_v30 }
 0x633   : > { %v690_v62 = vpop.f32.mrf.mxu1 }
 0x634   : > { %v691_v63 = vadd.f32 %v4261_v22, %v690_v62 }
 0x635   : > { %v3559_v31 = vpop.f32.mrf.mxu1 }
 0x636   : > { %777 = vrot.lane.b32.xlu0 %v691_v63, %s4111_s11 }
 0x63b   : > { %v764_v32 = vpop.f32.mrf.mxu1 }
 0x63c   : > { %v765_v36 = vadd.f32 %v4286_v27, %v764_v32 }
 0x63d   : > { %v3570_v33 = vpop.f32.mrf.mxu1 }
 0x63e   : > { %v768_v37 = vsub.f32 0.0, %v765_v36 }
 0x640   : > { %v769_v38 = vmul.f32 1.442695, %v768_v37 }
 0x642   : > { %3994 = vpow2.f32 %v769_v38 }
 0x64f   : > { %v3995_v39 = vpop.eup %3994 }
 0x650   : > { %v771_v40 = vadd.f32 1.0, %v3995_v39 }
 0x652   : > { %3996 = vrcp.f32 %v771_v40 }
 0x65f   : > { %v3997_v41 = vpop.eup %3996 }
 0x660   : > { %3998 = vrcp.f32 %v3997_v41  ;;  %v800_v52 = vmul.f32 %v3997_v41, %v799_v47 }
 0x66d   : > { %v3999_v46 = vpop.eup %3998 }
 0x6a8   : > { %v778_v34 = vpop.permute.xlu0 %777 }
 0x6a9   : > { %v780_v35 = vsub.f32 %v691_v63, %v778_v34 }
 0x6ab   : > { %782 = vrot.lane.b32.xlu1 %v780_v35, %s4112_s12 }
 0x71d   : > { %v783_v44 = vpop.permute.xlu1 %782 }
 0x71e   : > { %v785_v45 = vmul.f32 %v3104_v42, %v783_v44 }
 0x720   : > { %v4511_v48 = vmul.f32 %v3999_v46, %v785_v45  ;;  %v794_v49 = vadd.f32 %v785_v45, %v691_v63 }
 0x722   : > { %v795_v50 = vmul.f32 0.01, %v794_v49 }
 0x724   : > { %v796_v51 = vadd.f32 %v795_v50, %v4436_v58  ;;  %v3110_v58 = vld [vmem:[%s4366_s9 + $0x8] sm:$0xf] }
 0x726   : > { %v4514_v54 = vadd.f32 %v800_v52, %v796_v51 }
 0x728   : > { %3574 = vmatmul.mubr.msk.f32.vlgmr.msra.gmra.mxu0 %vm63_vm2, %v4514_v54 }
 0x729   : > { %3604 = vmatpush3.msra.mxu0 %v4256_v21  ;;  %3619 = vmatprep.mubr.msk.f32.mxu0 %vm4109_vm1, %v4108_v30 }
 0x72a   : > { %3605 = vmatprep.subr.mxu0 %v4108_v30 }
 0x72b   : > { %3606 = vmatpush3.msra.mxu0 %v4251_v20 }
 0x72c   : > { %3607 = vmatprep.subr.mxu0 %v4108_v30 }
 0x72d   : > { %3608 = vmatpush3.msra.mxu0 %v4246_v19 }
 0x72e   : > { %3609 = vmatprep.subr.mxu0 %v4108_v30 }
 0x72f   : > { %3610 = vmatpush3.msra.mxu0 %v4241_v18 }
 0x730   : > { %3611 = vmatprep.subr.mxu0 %v4108_v30 }
 0x731   : > { %3612 = vmatpush3.msra.mxu0 %v4236_v17 }
 0x732   : > { %3613 = vmatprep.subr.mxu0 %v4108_v30 }
 0x733   : > { %3614 = vmatpush3.msra.mxu0 %v4231_v16 }
 0x734   : > { %3615 = vmatprep.subr.mxu0 %v4108_v30 }
 0x735   : > { %3616 = vmatpush3.msra.mxu0 %v4226_v15 }
 0x736   : > { %3617 = vmatprep.subr.mxu0 %v4108_v30 }
 0x737   : > { %3618 = vmatpush3.msra.mxu0 %v4221_v14 }
 0x738   : > { %3622 = vmatprep.subr.mxu0 %v4108_v30 }
 0x7e8   : > { %v875_v55 = vpop.f32.mrf.mxu0 }
 0x7e9   : > { %v876_v56 = vadd.f32 %v3110_v58, %v875_v55 }
 0x7ea   : > { %v3575_v57 = vpop.f32.mrf.mxu0 }
 0x7eb   : > { %v879_v28 = vand.u32 2147483647, %v876_v56  ;;  %v892_v36 = vmax.f32 %v876_v56, 0.0 }
 0x7ed   : > { %v880_v59 = vsub.f32 0.0, %v879_v28 }
 0x7ef   : > { %v881_v60 = vmul.f32 1.442695, %v880_v59 }
 0x7f1   : > { %4000 = vpow2.f32 %v881_v60 }
 0x7fe   : > { %v4001_v61 = vpop.eup %4000 }
 0x7ff   : > { %v883_v62 = vadd.f32 1.0, %v4001_v61  ;;  %v886_v63 = vmul.f32 -0.5, %v4001_v61  ;;  %v889_v32 = vand.u32 2147483647, %v4001_v61 }
 0x801   : > { %4002 = vlog2.f32 %v883_v62  ;;  %v887_v31 = vadd.f32 1.0, %v886_v63  ;;  %vm890_vm10 = vcmp.lt.f32.partialorder %v889_v32, 0.0004427343 }
 0x803   : > { %v888_v35 = vmul.f32 %v4001_v61, %v887_v31 }
 0x80e   : > { %v4003_v33 = vpop.eup %4002 }
 0x80f   : > { %v885_v34 = vmul.f32 0.6931472, %v4003_v33 }
 0x811   : > { %v891_v37 = vsel %vm890_vm10, %v888_v35, %v885_v34 }
 0x812   : > { %v893_v38 = vadd.f32 %v892_v36, %v891_v37 }
 0x814   : > { %1055 = vrot.lane.b32.xlu0 %v893_v38, %s4110_s10  ;;  %3601 = vmatmul.mubr.msk.f32.vlgmr.msra.gmra.mxu1 %vm160_vm4, %v893_v38 }
 0x815   : > { %3634 = vmatpush3.msk.msra.mxu1 %vm67_vm0, %v4151_v0  ;;  %3635 = vmatprep.mubr.msk.f32.mxu1 %vm4109_vm1, %v4108_v30 }
 0x816   : > { %3665 = vmatprep.subr.mxu1 %v4108_v30 }
 0x886   : > { %v1056_v28 = vpop.permute.xlu0 %1055 }
 0x8d4   : > { %v963_v39 = vpop.f32.mrf.mxu1 }
 0x8d5   : > { %v964_v40 = vadd.f32 %v4216_v13, %v963_v39  ;;  %v3118_v39 = vld [vmem:[%s4423_s15 + $0x8] sm:$0xf] }
 0x8d6   : > { %v3602_v41 = vpop.f32.mrf.mxu1 }
 0x8d7   : > { %v967_v42 = vand.u32 2147483647, %v964_v40  ;;  %v980_v55 = vmax.f32 %v964_v40, 0.0  ;;  %v3121_v40 = vld [vmem:[%s4429_s18 + $0x8] sm:$0xf] }
 0x8d9   : > { %v968_v43 = vsub.f32 0.0, %v967_v42 }
 0x8db   : > { %v969_v44 = vmul.f32 1.442695, %v968_v43 }
 0x8dd   : > { %4004 = vpow2.f32 %v969_v44  ;;  %v1160_v44 = vmul.f32 0.1, %v3121_v40 }
 0x8ea   : > { %v4005_v45 = vpop.eup %4004 }
 0x8eb   : > { %v971_v46 = vadd.f32 1.0, %v4005_v45  ;;  %v974_v47 = vmul.f32 -0.5, %v4005_v45  ;;  %v977_v50 = vand.u32 2147483647, %v4005_v45 }
 0x8ed   : > { %4006 = vlog2.f32 %v971_v46  ;;  %v975_v49 = vadd.f32 1.0, %v974_v47  ;;  %vm978_vm11 = vcmp.lt.f32.partialorder %v977_v50, 0.0004427343 }
 0x8ef   : > { %v976_v58 = vmul.f32 %v4005_v45, %v975_v49 }
 0x8fa   : > { %v4007_v51 = vpop.eup %4006 }
 0x8fb   : > { %v973_v52 = vmul.f32 0.6931472, %v4007_v51 }
 0x8fd   : > { %v979_v56 = vsel %vm978_vm11, %v976_v58, %v973_v52 }
 0x8fe   : > { %v981_v57 = vadd.f32 %v980_v55, %v979_v56 }
 0x900   : > { %3620 = vmatmul.mubr.msk.f32.vlgmr.msra.gmra.mxu0 %vm253_vm6, %v981_v57 }
 0x901   : > { %3623 = vmatpush3.msra.mxu0 %v4281_v26  ;;  %3630 = vmatprep.mubr.msk.f32.mxu0 %vm4109_vm1, %v4108_v30 }
 0x902   : > { %3624 = vmatprep.subr.mxu0 %v4108_v30 }
 0x903   : > { %3625 = vmatpush3.msra.mxu0 %v4276_v25 }
 0x904   : > { %3626 = vmatprep.subr.mxu0 %v4108_v30 }
 0x905   : > { %3627 = vmatpush3.msra.mxu0 %v4271_v24 }
 0x906   : > { %3628 = vmatprep.subr.mxu0 %v4108_v30 }
 0x907   : > { %3629 = vmatpush3.msra.mxu0 %v4266_v23 }
 0x908   : > { %3631 = vmatmul.mubr.msk.f32.vlgmr.msra.gmra.mxu0 %vm333_vm7, %v1056_v28  ;;  %3638 = vmatprep.subr.mxu0 %v4108_v30 }
 0x909   : > { %3639 = vmatpush3.msra.mxu0 %v4211_v12  ;;  %3662 = vmatprep.mubr.msk.f32.mxu0 %vm4109_vm1, %v4108_v30 }
 0x90a   : > { %3640 = vmatprep.subr.mxu0 %v4108_v30 }
 0x90b   : > { %3641 = vmatpush3.msra.mxu0 %v4206_v11 }
 0x90c   : > { %3642 = vmatprep.subr.mxu0 %v4108_v30 }
 0x90d   : > { %3643 = vmatpush3.msra.mxu0 %v4201_v10 }
 0x90e   : > { %3644 = vmatprep.subr.mxu0 %v4108_v30 }
 0x90f   : > { %3645 = vmatpush3.msra.mxu0 %v4196_v9 }
 0x910   : > { %3646 = vmatprep.subr.mxu0 %v4108_v30 }
 0x911   : > { %3647 = vmatpush3.msra.mxu0 %v4191_v8 }
 0x912   : > { %3648 = vmatprep.subr.mxu0 %v4108_v30 }
 0x913   : > { %3649 = vmatpush3.msra.mxu0 %v4186_v7 }
 0x914   : > { %3650 = vmatprep.subr.mxu0 %v4108_v30 }
 0x915   : > { %3651 = vmatpush3.msra.mxu0 %v4181_v6 }
 0x916   : > { %3652 = vmatprep.subr.mxu0 %v4108_v30 }
 0x917   : > { %3653 = vmatpush3.msra.mxu0 %v4176_v5 }
 0x918   : > { %3654 = vmatprep.subr.mxu0 %v4108_v30 }
 0x919   : > { %3655 = vmatpush3.msra.mxu0 %v4171_v4 }
 0x91a   : > { %3656 = vmatprep.subr.mxu0 %v4108_v30 }
 0x91b   : > { %3657 = vmatpush3.msra.mxu0 %v4166_v3 }
 0x91c   : > { %3658 = vmatprep.subr.mxu0 %v4108_v30 }
 0x91d   : > { %3659 = vmatpush3.msra.mxu0 %v4161_v2 }
 0x91e   : > { %3660 = vmatprep.subr.mxu0 %v4108_v30 }
 0x91f   : > { %3661 = vmatpush3.msra.mxu0 %v4156_v1 }
 0x920   : > { %3695 = vmatprep.subr.mxu0 %v4108_v30 }
 0x9c0   : > { %v1051_v59 = vpop.f32.mrf.mxu0 }
 0x9c1   : > { %v1052_v60 = vadd.f32 %v4261_v22, %v1051_v59 }
 0x9c2   : > { %v3621_v61 = vpop.f32.mrf.mxu0 }
 0x9c3   : > { %1138 = vrot.lane.b32.xlu1 %v1052_v60, %s4111_s11 }
 0x9c8   : > { %v1125_v62 = vpop.f32.mrf.mxu0 }
 0x9c9   : > { %v1126_v33 = vadd.f32 %v4286_v27, %v1125_v62 }
 0x9ca   : > { %v3632_v63 = vpop.f32.mrf.mxu0 }
 0x9cb   : > { %v1129_v34 = vsub.f32 0.0, %v1126_v33 }
 0x9cd   : > { %v1130_v35 = vmul.f32 1.442695, %v1129_v34 }
 0x9cf   : > { %4008 = vpow2.f32 %v1130_v35 }
 0x9dc   : > { %v4009_v36 = vpop.eup %4008 }
 0x9dd   : > { %v1132_v37 = vadd.f32 1.0, %v4009_v36 }
 0x9df   : > { %4010 = vrcp.f32 %v1132_v37 }
 0x9ec   : > { %v4011_v38 = vpop.eup %4010 }
 0x9ed   : > { %4012 = vrcp.f32 %v4011_v38  ;;  %v1161_v50 = vmul.f32 %v4011_v38, %v1160_v44 }
 0x9fa   : > { %v4013_v43 = vpop.eup %4012 }
 0xa35   : > { %v1139_v31 = vpop.permute.xlu1 %1138 }
 0xa36   : > { %v1141_v32 = vsub.f32 %v1052_v60, %v1139_v31 }
 0xa38   : > { %1143 = vrot.lane.b32.xlu0 %v1141_v32, %s4112_s12 }
 0xaaa   : > { %v1144_v41 = vpop.permute.xlu0 %1143 }
 0xaab   : > { %v1146_v42 = vmul.f32 %v3118_v39, %v1144_v41 }
 0xaad   : > { %v4589_v45 = vmul.f32 %v4013_v43, %v1146_v42  ;;  %v1155_v46 = vadd.f32 %v1146_v42, %v1052_v60 }
 0xaaf   : > { %v1156_v47 = vmul.f32 0.01, %v1155_v46 }
 0xab1   : > { %v1157_v49 = vadd.f32 %v1156_v47, %v4514_v54  ;;  %v3124_v54 = vld [vmem:[%s4366_s9 + $0xc] sm:$0xf] }
 0xab3   : > { %v4592_v51 = vadd.f32 %v1161_v50, %v1157_v49 }
 0xab5   : > { %3636 = vmatmul.mubr.msk.f32.vlgmr.msra.gmra.mxu1 %vm63_vm2, %v4592_v51 }
 0xab6   : > { %3666 = vmatpush3.msra.mxu1 %v4256_v21  ;;  %3681 = vmatprep.mubr.msk.f32.mxu1 %vm4109_vm1, %v4108_v30 }
 0xab7   : > { %3667 = vmatprep.subr.mxu1 %v4108_v30 }
 0xab8   : > { %3668 = vmatpush3.msra.mxu1 %v4251_v20 }
 0xab9   : > { %3669 = vmatprep.subr.mxu1 %v4108_v30 }
 0xaba   : > { %3670 = vmatpush3.msra.mxu1 %v4246_v19 }
 0xabb   : > { %3671 = vmatprep.subr.mxu1 %v4108_v30 }
 0xabc   : > { %3672 = vmatpush3.msra.mxu1 %v4241_v18 }
 0xabd   : > { %3673 = vmatprep.subr.mxu1 %v4108_v30 }
 0xabe   : > { %3674 = vmatpush3.msra.mxu1 %v4236_v17 }
 0xabf   : > { %3675 = vmatprep.subr.mxu1 %v4108_v30 }
 0xac0   : > { %3676 = vmatpush3.msra.mxu1 %v4231_v16 }
 0xac1   : > { %3677 = vmatprep.subr.mxu1 %v4108_v30 }
 0xac2   : > { %3678 = vmatpush3.msra.mxu1 %v4226_v15 }
 0xac3   : > { %3679 = vmatprep.subr.mxu1 %v4108_v30 }
 0xac4   : > { %3680 = vmatpush3.msra.mxu1 %v4221_v14 }
 0xac5   : > { %3684 = vmatprep.subr.mxu1 %v4108_v30 }
 0xb75   : > { %v1236_v52 = vpop.f32.mrf.mxu1 }
 0xb76   : > { %v1237_v58 = vadd.f32 %v3124_v54, %v1236_v52 }
 0xb77   : > { %v3637_v55 = vpop.f32.mrf.mxu1 }
 0xb78   : > { %v1240_v56 = vand.u32 2147483647, %v1237_v58  ;;  %v1253_v34 = vmax.f32 %v1237_v58, 0.0 }
 0xb7a   : > { %v1241_v57 = vsub.f32 0.0, %v1240_v56 }
 0xb7c   : > { %v1242_v28 = vmul.f32 1.442695, %v1241_v57 }
 0xb7e   : > { %4014 = vpow2.f32 %v1242_v28 }
 0xb8b   : > { %v4015_v59 = vpop.eup %4014 }
 0xb8c   : > { %v1244_v60 = vadd.f32 1.0, %v4015_v59  ;;  %v1247_v61 = vmul.f32 -0.5, %v4015_v59  ;;  %v1250_v63 = vand.u32 2147483647, %v4015_v59 }
 0xb8e   : > { %4016 = vlog2.f32 %v1244_v60  ;;  %v1248_v62 = vadd.f32 1.0, %v1247_v61  ;;  %vm1251_vm12 = vcmp.lt.f32.partialorder %v1250_v63, 0.0004427343 }
 0xb90   : > { %v1249_v33 = vmul.f32 %v4015_v59, %v1248_v62 }
 0xb9b   : > { %v4017_v31 = vpop.eup %4016 }
 0xb9c   : > { %v1246_v32 = vmul.f32 0.6931472, %v4017_v31 }
 0xb9e   : > { %v1252_v35 = vsel %vm1251_vm12, %v1249_v33, %v1246_v32 }
 0xb9f   : > { %v1254_v36 = vadd.f32 %v1253_v34, %v1252_v35 }
 0xba1   : > { %1416 = vrot.lane.b32.xlu1 %v1254_v36, %s4110_s10  ;;  %3663 = vmatmul.mubr.msk.f32.vlgmr.msra.gmra.mxu0 %vm160_vm4, %v1254_v36 }
 0xba2   : > { %3696 = vmatpush3.msk.msra.mxu0 %vm67_vm0, %v4151_v0  ;;  %3697 = vmatprep.mubr.msk.f32.mxu0 %vm4109_vm1, %v4108_v30 }
 0xba3   : > { %3727 = vmatprep.subr.mxu0 %v4108_v30 }
 0xc13   : > { %v1417_v57 = vpop.permute.xlu1 %1416 }
 0xc61   : > { %v1324_v37 = vpop.f32.mrf.mxu0 }
 0xc62   : > { %v1325_v38 = vadd.f32 %v4216_v13, %v1324_v37 }
 0xc63   : > { %v3664_v39 = vpop.f32.mrf.mxu0 }
 0xc64   : > { %v1328_v40 = vand.u32 2147483647, %v1325_v38  ;;  %v1341_v58 = vmax.f32 %v1325_v38, 0.0  ;;  %v3132_v38 = vld [vmem:[%s4423_s15 + $0xc] sm:$0xf] }
 0xc65   : > { %v3135_v39 = vld [vmem:[%s4429_s18 + $0xc] sm:$0xf] }
 0xc66   : > { %v1329_v41 = vsub.f32 0.0, %v1328_v40 }
 0xc68   : > { %v1330_v42 = vmul.f32 1.442695, %v1329_v41 }
 0xc6a   : > { %4018 = vpow2.f32 %v1330_v42 }
 0xc77   : > { %v4019_v43 = vpop.eup %4018 }
 0xc78   : > { %v1332_v44 = vadd.f32 1.0, %v4019_v43  ;;  %v1335_v46 = vmul.f32 -0.5, %v4019_v43  ;;  %v1338_v49 = vand.u32 2147483647, %v4019_v43 }
 0xc7a   : > { %4020 = vlog2.f32 %v1332_v44  ;;  %v1336_v47 = vadd.f32 1.0, %v1335_v46  ;;  %vm1339_vm13 = vcmp.lt.f32.partialorder %v1338_v49, 0.0004427343 }
 0xc7c   : > { %v1337_v52 = vmul.f32 %v4019_v43, %v1336_v47  ;;  %v1521_v43 = vmul.f32 0.1, %v3135_v39 }
 0xc87   : > { %v4021_v50 = vpop.eup %4020 }
 0xc88   : > { %v1334_v54 = vmul.f32 0.6931472, %v4021_v50 }
 0xc8a   : > { %v1340_v55 = vsel %vm1339_vm13, %v1337_v52, %v1334_v54 }
 0xc8b   : > { %v1342_v56 = vadd.f32 %v1341_v58, %v1340_v55 }
 0xc8d   : > { %3682 = vmatmul.mubr.msk.f32.vlgmr.msra.gmra.mxu1 %vm253_vm6, %v1342_v56 }
 0xc8e   : > { %3685 = vmatpush3.msra.mxu1 %v4281_v26  ;;  %3692 = vmatprep.mubr.msk.f32.mxu1 %vm4109_vm1, %v4108_v30 }
 0xc8f   : > { %3686 = vmatprep.subr.mxu1 %v4108_v30 }
 0xc90   : > { %3687 = vmatpush3.msra.mxu1 %v4276_v25 }
 0xc91   : > { %3688 = vmatprep.subr.mxu1 %v4108_v30 }
 0xc92   : > { %3689 = vmatpush3.msra.mxu1 %v4271_v24 }
 0xc93   : > { %3690 = vmatprep.subr.mxu1 %v4108_v30 }
 0xc94   : > { %3691 = vmatpush3.msra.mxu1 %v4266_v23 }
 0xc95   : > { %3693 = vmatmul.mubr.msk.f32.vlgmr.msra.gmra.mxu1 %vm333_vm7, %v1417_v57  ;;  %3700 = vmatprep.subr.mxu1 %v4108_v30 }
 0xc96   : > { %3701 = vmatpush3.msra.mxu1 %v4211_v12  ;;  %3724 = vmatprep.mubr.msk.f32.mxu1 %vm4109_vm1, %v4108_v30 }
 0xc97   : > { %3702 = vmatprep.subr.mxu1 %v4108_v30 }
 0xc98   : > { %3703 = vmatpush3.msra.mxu1 %v4206_v11 }
 0xc99   : > { %3704 = vmatprep.subr.mxu1 %v4108_v30 }
 0xc9a   : > { %3705 = vmatpush3.msra.mxu1 %v4201_v10 }
 0xc9b   : > { %3706 = vmatprep.subr.mxu1 %v4108_v30 }
 0xc9c   : > { %3707 = vmatpush3.msra.mxu1 %v4196_v9 }
 0xc9d   : > { %3708 = vmatprep.subr.mxu1 %v4108_v30 }
 0xc9e   : > { %3709 = vmatpush3.msra.mxu1 %v4191_v8 }
 0xc9f   : > { %3710 = vmatprep.subr.mxu1 %v4108_v30 }
 0xca0   : > { %3711 = vmatpush3.msra.mxu1 %v4186_v7 }
 0xca1   : > { %3712 = vmatprep.subr.mxu1 %v4108_v30 }
 0xca2   : > { %3713 = vmatpush3.msra.mxu1 %v4181_v6 }
 0xca3   : > { %3714 = vmatprep.subr.mxu1 %v4108_v30 }
 0xca4   : > { %3715 = vmatpush3.msra.mxu1 %v4176_v5 }
 0xca5   : > { %3716 = vmatprep.subr.mxu1 %v4108_v30 }
 0xca6   : > { %3717 = vmatpush3.msra.mxu1 %v4171_v4 }
 0xca7   : > { %3718 = vmatprep.subr.mxu1 %v4108_v30 }
 0xca8   : > { %3719 = vmatpush3.msra.mxu1 %v4166_v3 }
 0xca9   : > { %3720 = vmatprep.subr.mxu1 %v4108_v30 }
 0xcaa   : > { %3721 = vmatpush3.msra.mxu1 %v4161_v2 }
 0xcab   : > { %3722 = vmatprep.subr.mxu1 %v4108_v30 }
 0xcac   : > { %3723 = vmatpush3.msra.mxu1 %v4156_v1 }
 0xcad   : > { %3757 = vmatprep.subr.mxu1 %v4108_v30 }
 0xd4d   : > { %v1412_v28 = vpop.f32.mrf.mxu1 }
 0xd4e   : > { %v1413_v59 = vadd.f32 %v4261_v22, %v1412_v28 }
 0xd4f   : > { %v3683_v60 = vpop.f32.mrf.mxu1 }
 0xd50   : > { %1499 = vrot.lane.b32.xlu0 %v1413_v59, %s4111_s11 }
 0xd55   : > { %v1486_v61 = vpop.f32.mrf.mxu1 }
 0xd56   : > { %v1487_v32 = vadd.f32 %v4286_v27, %v1486_v61 }
 0xd57   : > { %v3694_v62 = vpop.f32.mrf.mxu1 }
 0xd58   : > { %v1490_v33 = vsub.f32 0.0, %v1487_v32 }
 0xd5a   : > { %v1491_v34 = vmul.f32 1.442695, %v1490_v33 }
 0xd5c   : > { %4022 = vpow2.f32 %v1491_v34 }
 0xd69   : > { %v4023_v35 = vpop.eup %4022 }
 0xd6a   : > { %v1493_v36 = vadd.f32 1.0, %v4023_v35 }
 0xd6c   : > { %4024 = vrcp.f32 %v1493_v36 }
 0xd79   : > { %v4025_v37 = vpop.eup %4024 }
 0xd7a   : > { %4026 = vrcp.f32 %v4025_v37  ;;  %v1522_v50 = vmul.f32 %v4025_v37, %v1521_v43 }
 0xd87   : > { %v4027_v42 = vpop.eup %4026 }
 0xdc2   : > { %v1500_v63 = vpop.permute.xlu0 %1499 }
 0xdc3   : > { %v1502_v31 = vsub.f32 %v1413_v59, %v1500_v63 }
 0xdc5   : > { %1504 = vrot.lane.b32.xlu1 %v1502_v31, %s4112_s12 }
 0xe37   : > { %v1505_v40 = vpop.permute.xlu1 %1504 }
 0xe38   : > { %v1507_v41 = vmul.f32 %v3132_v38, %v1505_v40 }
 0xe3a   : > { %v4667_v44 = vmul.f32 %v4027_v42, %v1507_v41  ;;  %v1516_v46 = vadd.f32 %v1507_v41, %v1413_v59 }
 0xe3c   : > { %v1517_v47 = vmul.f32 0.01, %v1516_v46 }
 0xe3e   : > { %v1518_v49 = vadd.f32 %v1517_v47, %v4592_v51  ;;  %v3138_v51 = vld [vmem:[%s4366_s9 + $0x10] sm:$0xf] }
 0xe40   : > { %v4670_v54 = vadd.f32 %v1522_v50, %v1518_v49 }
 0xe42   : > { %3698 = vmatmul.mubr.msk.f32.vlgmr.msra.gmra.mxu0 %vm63_vm2, %v4670_v54 }
 0xe43   : > { %3728 = vmatpush3.msra.mxu0 %v4256_v21  ;;  %3743 = vmatprep.mubr.msk.f32.mxu0 %vm4109_vm1, %v4108_v30 }
 0xe44   : > { %3729 = vmatprep.subr.mxu0 %v4108_v30 }
 0xe45   : > { %3730 = vmatpush3.msra.mxu0 %v4251_v20 }
 0xe46   : > { %3731 = vmatprep.subr.mxu0 %v4108_v30 }
 0xe47   : > { %3732 = vmatpush3.msra.mxu0 %v4246_v19 }
 0xe48   : > { %3733 = vmatprep.subr.mxu0 %v4108_v30 }
 0xe49   : > { %3734 = vmatpush3.msra.mxu0 %v4241_v18 }
 0xe4a   : > { %3735 = vmatprep.subr.mxu0 %v4108_v30 }
 0xe4b   : > { %3736 = vmatpush3.msra.mxu0 %v4236_v17 }
 0xe4c   : > { %3737 = vmatprep.subr.mxu0 %v4108_v30 }
 0xe4d   : > { %3738 = vmatpush3.msra.mxu0 %v4231_v16 }
 0xe4e   : > { %3739 = vmatprep.subr.mxu0 %v4108_v30 }
 0xe4f   : > { %3740 = vmatpush3.msra.mxu0 %v4226_v15 }
 0xe50   : > { %3741 = vmatprep.subr.mxu0 %v4108_v30 }
 0xe51   : > { %3742 = vmatpush3.msra.mxu0 %v4221_v14 }
 0xe52   : > { %3746 = vmatprep.subr.mxu0 %v4108_v30 }
 0xf02   : > { %v1597_v52 = vpop.f32.mrf.mxu0 }
 0xf03   : > { %v1598_v58 = vadd.f32 %v3138_v51, %v1597_v52 }
 0xf04   : > { %v3699_v55 = vpop.f32.mrf.mxu0 }
 0xf05   : > { %v1601_v56 = vand.u32 2147483647, %v1598_v58  ;;  %v1614_v34 = vmax.f32 %v1598_v58, 0.0 }
 0xf07   : > { %v1602_v57 = vsub.f32 0.0, %v1601_v56 }
 0xf09   : > { %v1603_v28 = vmul.f32 1.442695, %v1602_v57 }
 0xf0b   : > { %4028 = vpow2.f32 %v1603_v28 }
 0xf18   : > { %v4029_v59 = vpop.eup %4028 }
 0xf19   : > { %v1605_v60 = vadd.f32 1.0, %v4029_v59  ;;  %v1608_v61 = vmul.f32 -0.5, %v4029_v59  ;;  %v1611_v63 = vand.u32 2147483647, %v4029_v59 }
 0xf1b   : > { %4030 = vlog2.f32 %v1605_v60  ;;  %v1609_v62 = vadd.f32 1.0, %v1608_v61  ;;  %vm1612_vm14 = vcmp.lt.f32.partialorder %v1611_v63, 0.0004427343 }
 0xf1d   : > { %v1610_v33 = vmul.f32 %v4029_v59, %v1609_v62 }
 0xf28   : > { %v4031_v31 = vpop.eup %4030 }
 0xf29   : > { %v1607_v32 = vmul.f32 0.6931472, %v4031_v31 }
 0xf2b   : > { %v1613_v35 = vsel %vm1612_vm14, %v1610_v33, %v1607_v32 }
 0xf2c   : > { %v1615_v36 = vadd.f32 %v1614_v34, %v1613_v35 }
 0xf2e   : > { %1777 = vrot.lane.b32.xlu0 %v1615_v36, %s4110_s10  ;;  %3725 = vmatmul.mubr.msk.f32.vlgmr.msra.gmra.mxu1 %vm160_vm4, %v1615_v36 }
 0xf2f   : > { %3758 = vmatpush3.msk.msra.mxu1 %vm67_vm0, %v4151_v0  ;;  %3759 = vmatprep.mubr.msk.f32.mxu1 %vm4109_vm1, %v4108_v30 }
 0xf30   : > { %3789 = vmatprep.subr.mxu1 %v4108_v30 }
 0xfa0   : > { %v1778_v28 = vpop.permute.xlu0 %1777 }
 0xfee   : > { %v1685_v37 = vpop.f32.mrf.mxu1 }
 0xfef   : > { %v1686_v38 = vadd.f32 %v4216_v13, %v1685_v37 }
 0xff0   : > { %v3726_v39 = vpop.f32.mrf.mxu1 }
 0xff1   : > { %v1689_v40 = vand.u32 2147483647, %v1686_v38  ;;  %v1702_v55 = vmax.f32 %v1686_v38, 0.0  ;;  %v3146_v39 = vld [vmem:[%s4423_s15 + $0x10] sm:$0xf] }
 0xff3   : > { %v1690_v41 = vsub.f32 0.0, %v1689_v40  ;;  %v3149_v40 = vld [vmem:[%s4429_s18 + $0x10] sm:$0xf] }
 0xff5   : > { %v1691_v42 = vmul.f32 1.442695, %v1690_v41 }
 0xff7   : > { %4032 = vpow2.f32 %v1691_v42 }
0x1004   : > { %v4033_v43 = vpop.eup %4032 }
0x1005   : > { %v1693_v46 = vadd.f32 1.0, %v4033_v43  ;;  %v1696_v47 = vmul.f32 -0.5, %v4033_v43  ;;  %v1699_v50 = vand.u32 2147483647, %v4033_v43 }
0x1007   : > { %4034 = vlog2.f32 %v1693_v46  ;;  %v1697_v49 = vadd.f32 1.0, %v1696_v47  ;;  %vm1700_vm15 = vcmp.lt.f32.partialorder %v1699_v50, 0.0004427343  ;;  %v1882_v46 = vmul.f32 0.1, %v3149_v40 }
0x1009   : > { %v1698_v58 = vmul.f32 %v4033_v43, %v1697_v49 }
0x1014   : > { %v4035_v51 = vpop.eup %4034 }
0x1015   : > { %v1695_v52 = vmul.f32 0.6931472, %v4035_v51 }
0x1017   : > { %v1701_v56 = vsel %vm1700_vm15, %v1698_v58, %v1695_v52 }
0x1018   : > { %v1703_v57 = vadd.f32 %v1702_v55, %v1701_v56 }
0x101a   : > { %3744 = vmatmul.mubr.msk.f32.vlgmr.msra.gmra.mxu0 %vm253_vm6, %v1703_v57 }
0x101b   : > { %3747 = vmatpush3.msra.mxu0 %v4281_v26  ;;  %3754 = vmatprep.mubr.msk.f32.mxu0 %vm4109_vm1, %v4108_v30 }
0x101c   : > { %3748 = vmatprep.subr.mxu0 %v4108_v30 }
0x101d   : > { %3749 = vmatpush3.msra.mxu0 %v4276_v25 }
0x101e   : > { %3750 = vmatprep.subr.mxu0 %v4108_v30 }
0x101f   : > { %3751 = vmatpush3.msra.mxu0 %v4271_v24 }
0x1020   : > { %3752 = vmatprep.subr.mxu0 %v4108_v30 }
0x1021   : > { %3753 = vmatpush3.msra.mxu0 %v4266_v23 }
0x1022   : > { %3755 = vmatmul.mubr.msk.f32.vlgmr.msra.gmra.mxu0 %vm333_vm7, %v1778_v28  ;;  %3762 = vmatprep.subr.mxu0 %v4108_v30 }
0x1023   : > { %3763 = vmatpush3.msra.mxu0 %v4211_v12  ;;  %3786 = vmatprep.mubr.msk.f32.mxu0 %vm4109_vm1, %v4108_v30 }
0x1024   : > { %3764 = vmatprep.subr.mxu0 %v4108_v30 }
0x1025   : > { %3765 = vmatpush3.msra.mxu0 %v4206_v11 }
0x1026   : > { %3766 = vmatprep.subr.mxu0 %v4108_v30 }
0x1027   : > { %3767 = vmatpush3.msra.mxu0 %v4201_v10 }
0x1028   : > { %3768 = vmatprep.subr.mxu0 %v4108_v30 }
0x1029   : > { %3769 = vmatpush3.msra.mxu0 %v4196_v9 }
0x102a   : > { %3770 = vmatprep.subr.mxu0 %v4108_v30 }
0x102b   : > { %3771 = vmatpush3.msra.mxu0 %v4191_v8 }
0x102c   : > { %3772 = vmatprep.subr.mxu0 %v4108_v30 }
0x102d   : > { %3773 = vmatpush3.msra.mxu0 %v4186_v7 }
0x102e   : > { %3774 = vmatprep.subr.mxu0 %v4108_v30 }
0x102f   : > { %3775 = vmatpush3.msra.mxu0 %v4181_v6 }
0x1030   : > { %3776 = vmatprep.subr.mxu0 %v4108_v30 }
0x1031   : > { %3777 = vmatpush3.msra.mxu0 %v4176_v5 }
0x1032   : > { %3778 = vmatprep.subr.mxu0 %v4108_v30 }
0x1033   : > { %3779 = vmatpush3.msra.mxu0 %v4171_v4 }
0x1034   : > { %3780 = vmatprep.subr.mxu0 %v4108_v30 }
0x1035   : > { %3781 = vmatpush3.msra.mxu0 %v4166_v3 }
0x1036   : > { %3782 = vmatprep.subr.mxu0 %v4108_v30 }
0x1037   : > { %3783 = vmatpush3.msra.mxu0 %v4161_v2 }
0x1038   : > { %3784 = vmatprep.subr.mxu0 %v4108_v30 }
0x1039   : > { %3785 = vmatpush3.msra.mxu0 %v4156_v1 }
0x103a   : > { %3819 = vmatprep.subr.mxu0 %v4108_v30 }
0x10da   : > { %v1773_v59 = vpop.f32.mrf.mxu0 }
0x10db   : > { %v1774_v60 = vadd.f32 %v4261_v22, %v1773_v59 }
0x10dc   : > { %v3745_v61 = vpop.f32.mrf.mxu0 }
0x10dd   : > { %1860 = vrot.lane.b32.xlu1 %v1774_v60, %s4111_s11 }
0x10e2   : > { %v1847_v62 = vpop.f32.mrf.mxu0 }
0x10e3   : > { %v1848_v33 = vadd.f32 %v4286_v27, %v1847_v62 }
0x10e4   : > { %v3756_v63 = vpop.f32.mrf.mxu0 }
0x10e5   : > { %v1851_v34 = vsub.f32 0.0, %v1848_v33 }
0x10e7   : > { %v1852_v35 = vmul.f32 1.442695, %v1851_v34 }
0x10e9   : > { %4036 = vpow2.f32 %v1852_v35 }
0x10f6   : > { %v4037_v36 = vpop.eup %4036 }
0x10f7   : > { %v1854_v37 = vadd.f32 1.0, %v4037_v36 }
0x10f9   : > { %4038 = vrcp.f32 %v1854_v37 }
0x1106   : > { %v4039_v38 = vpop.eup %4038 }
0x1107   : > { %4040 = vrcp.f32 %v4039_v38  ;;  %v1883_v52 = vmul.f32 %v4039_v38, %v1882_v46 }
0x1114   : > { %v4041_v43 = vpop.eup %4040 }
0x114f   : > { %v1861_v31 = vpop.permute.xlu1 %1860 }
0x1150   : > { %v1863_v32 = vsub.f32 %v1774_v60, %v1861_v31 }
0x1152   : > { %1865 = vrot.lane.b32.xlu0 %v1863_v32, %s4112_s12 }
0x11c4   : > { %v1866_v41 = vpop.permute.xlu0 %1865 }
0x11c5   : > { %v1868_v42 = vmul.f32 %v3146_v39, %v1866_v41 }
0x11c7   : > { %v4745_v47 = vmul.f32 %v4041_v43, %v1868_v42  ;;  %v1877_v49 = vadd.f32 %v1868_v42, %v1774_v60 }
0x11c9   : > { %v1878_v50 = vmul.f32 0.01, %v1877_v49 }
0x11cb   : > { %v1879_v51 = vadd.f32 %v1878_v50, %v4670_v54  ;;  %v3152_v54 = vld [vmem:[%s4366_s9 + $0x14] sm:$0xf] }
0x11cd   : > { %v4748_v58 = vadd.f32 %v1883_v52, %v1879_v51 }
0x11cf   : > { %3760 = vmatmul.mubr.msk.f32.vlgmr.msra.gmra.mxu1 %vm63_vm2, %v4748_v58 }
0x11d0   : > { %3790 = vmatpush3.msra.mxu1 %v4256_v21  ;;  %3805 = vmatprep.mubr.msk.f32.mxu1 %vm4109_vm1, %v4108_v30 }
0x11d1   : > { %3791 = vmatprep.subr.mxu1 %v4108_v30 }
0x11d2   : > { %3792 = vmatpush3.msra.mxu1 %v4251_v20 }
0x11d3   : > { %3793 = vmatprep.subr.mxu1 %v4108_v30 }
0x11d4   : > { %3794 = vmatpush3.msra.mxu1 %v4246_v19 }
0x11d5   : > { %3795 = vmatprep.subr.mxu1 %v4108_v30 }
0x11d6   : > { %3796 = vmatpush3.msra.mxu1 %v4241_v18 }
0x11d7   : > { %3797 = vmatprep.subr.mxu1 %v4108_v30 }
0x11d8   : > { %3798 = vmatpush3.msra.mxu1 %v4236_v17 }
0x11d9   : > { %3799 = vmatprep.subr.mxu1 %v4108_v30 }
0x11da   : > { %3800 = vmatpush3.msra.mxu1 %v4231_v16 }
0x11db   : > { %3801 = vmatprep.subr.mxu1 %v4108_v30 }
0x11dc   : > { %3802 = vmatpush3.msra.mxu1 %v4226_v15 }
0x11dd   : > { %3803 = vmatprep.subr.mxu1 %v4108_v30 }
0x11de   : > { %3804 = vmatpush3.msra.mxu1 %v4221_v14 }
0x11df   : > { %3808 = vmatprep.subr.mxu1 %v4108_v30 }
0x128f   : > { %v1958_v55 = vpop.f32.mrf.mxu1 }
0x1290   : > { %v1959_v56 = vadd.f32 %v3152_v54, %v1958_v55 }
0x1291   : > { %v3761_v57 = vpop.f32.mrf.mxu1 }
0x1292   : > { %v1962_v28 = vand.u32 2147483647, %v1959_v56  ;;  %v1975_v36 = vmax.f32 %v1959_v56, 0.0 }
0x1294   : > { %v1963_v59 = vsub.f32 0.0, %v1962_v28 }
0x1296   : > { %v1964_v60 = vmul.f32 1.442695, %v1963_v59 }
0x1298   : > { %4042 = vpow2.f32 %v1964_v60 }
0x12a5   : > { %v4043_v61 = vpop.eup %4042 }
0x12a6   : > { %v1966_v62 = vadd.f32 1.0, %v4043_v61  ;;  %v1969_v63 = vmul.f32 -0.5, %v4043_v61  ;;  %v1972_v32 = vand.u32 2147483647, %v4043_v61 }
0x12a8   : > { %4044 = vlog2.f32 %v1966_v62  ;;  %v1970_v31 = vadd.f32 1.0, %v1969_v63  ;;  %vm1973_vm3 = vcmp.lt.f32.partialorder %v1972_v32, 0.0004427343 }
0x12aa   : > { %v1971_v35 = vmul.f32 %v4043_v61, %v1970_v31 }
0x12b5   : > { %v4045_v33 = vpop.eup %4044 }
0x12b6   : > { %v1968_v34 = vmul.f32 0.6931472, %v4045_v33 }
0x12b8   : > { %v1974_v37 = vsel %vm1973_vm3, %v1971_v35, %v1968_v34 }
0x12b9   : > { %v1976_v38 = vadd.f32 %v1975_v36, %v1974_v37 }
0x12bb   : > { %2138 = vrot.lane.b32.xlu1 %v1976_v38, %s4110_s10  ;;  %3787 = vmatmul.mubr.msk.f32.vlgmr.msra.gmra.mxu0 %vm160_vm4, %v1976_v38 }
0x12bc   : > { %3820 = vmatpush3.msk.msra.mxu0 %vm67_vm0, %v4151_v0  ;;  %3821 = vmatprep.mubr.msk.f32.mxu0 %vm4109_vm1, %v4108_v30 }
0x12bd   : > { %3851 = vmatprep.subr.mxu0 %v4108_v30 }
0x132d   : > { %v2139_v61 = vpop.permute.xlu1 %2138 }
0x137b   : > { %v2046_v39 = vpop.f32.mrf.mxu0 }
0x137c   : > { %v2047_v40 = vadd.f32 %v4216_v13, %v2046_v39 }
0x137d   : > { %v3788_v41 = vpop.f32.mrf.mxu0 }
0x137e   : > { %v2050_v42 = vand.u32 2147483647, %v2047_v40  ;;  %v2063_v28 = vmax.f32 %v2047_v40, 0.0 }
0x1380   : > { %v2051_v43 = vsub.f32 0.0, %v2050_v42  ;;  %v3160_v42 = vld [vmem:[%s4423_s15 + $0x14] sm:$0xf] }
0x1382   : > { %v2052_v46 = vmul.f32 1.442695, %v2051_v43  ;;  %v3163_v43 = vld [vmem:[%s4429_s18 + $0x14] sm:$0xf] }
0x1384   : > { %4046 = vpow2.f32 %v2052_v46 }
0x1391   : > { %v4047_v49 = vpop.eup %4046 }
0x1392   : > { %v2054_v50 = vadd.f32 1.0, %v4047_v49  ;;  %v2057_v51 = vmul.f32 -0.5, %v4047_v49  ;;  %v2060_v54 = vand.u32 2147483647, %v4047_v49 }
0x1394   : > { %4048 = vlog2.f32 %v2054_v50  ;;  %v2058_v52 = vadd.f32 1.0, %v2057_v51  ;;  %vm2061_vm5 = vcmp.lt.f32.partialorder %v2060_v54, 0.0004427343  ;;  %v2243_v51 = vmul.f32 0.1, %v3163_v43 }
0x1396   : > { %v2059_v57 = vmul.f32 %v4047_v49, %v2058_v52 }
0x13a1   : > { %v4049_v55 = vpop.eup %4048 }
0x13a2   : > { %v2056_v56 = vmul.f32 0.6931472, %v4049_v55 }
0x13a4   : > { %v2062_v59 = vsel %vm2061_vm5, %v2059_v57, %v2056_v56 }
0x13a5   : > { %v2064_v60 = vadd.f32 %v2063_v28, %v2062_v59 }
0x13a7   : > { %3806 = vmatmul.mubr.msk.f32.vlgmr.msra.gmra.mxu1 %vm253_vm6, %v2064_v60 }
0x13a8   : > { %3809 = vmatpush3.msra.mxu1 %v4281_v26  ;;  %3816 = vmatprep.mubr.msk.f32.mxu1 %vm4109_vm1, %v4108_v30 }
0x13a9   : > { %3810 = vmatprep.subr.mxu1 %v4108_v30 }
0x13aa   : > { %3811 = vmatpush3.msra.mxu1 %v4276_v25 }
0x13ab   : > { %3812 = vmatprep.subr.mxu1 %v4108_v30 }
0x13ac   : > { %3813 = vmatpush3.msra.mxu1 %v4271_v24 }
0x13ad   : > { %3814 = vmatprep.subr.mxu1 %v4108_v30 }
0x13ae   : > { %3815 = vmatpush3.msra.mxu1 %v4266_v23 }
0x13af   : > { %3817 = vmatmul.mubr.msk.f32.vlgmr.msra.gmra.mxu1 %vm333_vm7, %v2139_v61  ;;  %3824 = vmatprep.subr.mxu1 %v4108_v30 }
0x13b0   : > { %3825 = vmatpush3.msra.mxu1 %v4211_v12  ;;  %3848 = vmatprep.mubr.msk.f32.mxu1 %vm4109_vm1, %v4108_v30 }
0x13b1   : > { %3826 = vmatprep.subr.mxu1 %v4108_v30 }
0x13b2   : > { %3827 = vmatpush3.msra.mxu1 %v4206_v11 }
0x13b3   : > { %3828 = vmatprep.subr.mxu1 %v4108_v30 }
0x13b4   : > { %3829 = vmatpush3.msra.mxu1 %v4201_v10 }
0x13b5   : > { %3830 = vmatprep.subr.mxu1 %v4108_v30 }
0x13b6   : > { %3831 = vmatpush3.msra.mxu1 %v4196_v9 }
0x13b7   : > { %3832 = vmatprep.subr.mxu1 %v4108_v30 }
0x13b8   : > { %3833 = vmatpush3.msra.mxu1 %v4191_v8 }
0x13b9   : > { %3834 = vmatprep.subr.mxu1 %v4108_v30 }
0x13ba   : > { %3835 = vmatpush3.msra.mxu1 %v4186_v7 }
0x13bb   : > { %3836 = vmatprep.subr.mxu1 %v4108_v30 }
0x13bc   : > { %3837 = vmatpush3.msra.mxu1 %v4181_v6 }
0x13bd   : > { %3838 = vmatprep.subr.mxu1 %v4108_v30 }
0x13be   : > { %3839 = vmatpush3.msra.mxu1 %v4176_v5 }
0x13bf   : > { %3840 = vmatprep.subr.mxu1 %v4108_v30 }
0x13c0   : > { %3841 = vmatpush3.msra.mxu1 %v4171_v4 }
0x13c1   : > { %3842 = vmatprep.subr.mxu1 %v4108_v30 }
0x13c2   : > { %3843 = vmatpush3.msra.mxu1 %v4166_v3 }
0x13c3   : > { %3844 = vmatprep.subr.mxu1 %v4108_v30 }
0x13c4   : > { %3845 = vmatpush3.msra.mxu1 %v4161_v2 }
0x13c5   : > { %3846 = vmatprep.subr.mxu1 %v4108_v30 }
0x13c6   : > { %3847 = vmatpush3.msra.mxu1 %v4156_v1 }
0x13c7   : > { %3881 = vmatprep.subr.mxu1 %v4108_v30 }
0x1467   : > { %v2134_v62 = vpop.f32.mrf.mxu1 }
0x1468   : > { %v2135_v63 = vadd.f32 %v4261_v22, %v2134_v62 }
0x1469   : > { %v3807_v31 = vpop.f32.mrf.mxu1 }
0x146a   : > { %2221 = vrot.lane.b32.xlu0 %v2135_v63, %s4111_s11 }
0x146f   : > { %v2208_v32 = vpop.f32.mrf.mxu1 }
0x1470   : > { %v2209_v36 = vadd.f32 %v4286_v27, %v2208_v32 }
0x1471   : > { %v3818_v33 = vpop.f32.mrf.mxu1 }
0x1472   : > { %v2212_v37 = vsub.f32 0.0, %v2209_v36 }
0x1474   : > { %v2213_v38 = vmul.f32 1.442695, %v2212_v37 }
0x1476   : > { %4050 = vpow2.f32 %v2213_v38 }
0x1483   : > { %v4051_v39 = vpop.eup %4050 }
0x1484   : > { %v2215_v40 = vadd.f32 1.0, %v4051_v39 }
0x1486   : > { %4052 = vrcp.f32 %v2215_v40 }
0x1493   : > { %v4053_v41 = vpop.eup %4052 }
0x1494   : > { %4054 = vrcp.f32 %v4053_v41  ;;  %v2244_v57 = vmul.f32 %v4053_v41, %v2243_v51 }
0x14a1   : > { %v4055_v50 = vpop.eup %4054 }
0x14dc   : > { %v2222_v34 = vpop.permute.xlu0 %2221 }
0x14dd   : > { %v2224_v35 = vsub.f32 %v2135_v63, %v2222_v34 }
0x14df   : > { %2226 = vrot.lane.b32.xlu1 %v2224_v35, %s4112_s12 }
0x1551   : > { %v2227_v46 = vpop.permute.xlu1 %2226 }
0x1552   : > { %v2229_v49 = vmul.f32 %v3160_v42, %v2227_v46 }
0x1554   : > { %v4823_v52 = vmul.f32 %v4055_v50, %v2229_v49  ;;  %v2238_v54 = vadd.f32 %v2229_v49, %v2135_v63 }
0x1556   : > { %v2239_v55 = vmul.f32 0.01, %v2238_v54 }
0x1558   : > { %v2240_v56 = vadd.f32 %v2239_v55, %v4748_v58  ;;  %v3166_v58 = vld [vmem:[%s4366_s9 + $0x18] sm:$0xf] }
0x155a   : > { %v4826_v28 = vadd.f32 %v2244_v57, %v2240_v56 }
0x155c   : > { %3822 = vmatmul.mubr.msk.f32.vlgmr.msra.gmra.mxu0 %vm63_vm2, %v4826_v28 }
0x155d   : > { %3852 = vmatpush3.msra.mxu0 %v4256_v21  ;;  %3867 = vmatprep.mubr.msk.f32.mxu0 %vm4109_vm1, %v4108_v30 }
0x155e   : > { %3853 = vmatprep.subr.mxu0 %v4108_v30 }
0x155f   : > { %3854 = vmatpush3.msra.mxu0 %v4251_v20 }
0x1560   : > { %3855 = vmatprep.subr.mxu0 %v4108_v30 }
0x1561   : > { %3856 = vmatpush3.msra.mxu0 %v4246_v19 }
0x1562   : > { %3857 = vmatprep.subr.mxu0 %v4108_v30 }
0x1563   : > { %3858 = vmatpush3.msra.mxu0 %v4241_v18 }
0x1564   : > { %3859 = vmatprep.subr.mxu0 %v4108_v30 }
0x1565   : > { %3860 = vmatpush3.msra.mxu0 %v4236_v17 }
0x1566   : > { %3861 = vmatprep.subr.mxu0 %v4108_v30 }
0x1567   : > { %3862 = vmatpush3.msra.mxu0 %v4231_v16 }
0x1568   : > { %3863 = vmatprep.subr.mxu0 %v4108_v30 }
0x1569   : > { %3864 = vmatpush3.msra.mxu0 %v4226_v15 }
0x156a   : > { %3865 = vmatprep.subr.mxu0 %v4108_v30 }
0x156b   : > { %3866 = vmatpush3.msra.mxu0 %v4221_v14 }
0x156c   : > { %3870 = vmatprep.subr.mxu0 %v4108_v30 }
0x161c   : > { %v2319_v59 = vpop.f32.mrf.mxu0 }
0x161d   : > { %v2320_v60 = vadd.f32 %v3166_v58, %v2319_v59 }
0x161e   : > { %v3823_v61 = vpop.f32.mrf.mxu0 }
0x161f   : > { %v2323_v62 = vand.u32 2147483647, %v2320_v60  ;;  %v2336_v40 = vmax.f32 %v2320_v60, 0.0 }
0x1621   : > { %v2324_v63 = vsub.f32 0.0, %v2323_v62 }
0x1623   : > { %v2325_v31 = vmul.f32 1.442695, %v2324_v63 }
0x1625   : > { %4056 = vpow2.f32 %v2325_v31 }
0x1632   : > { %v4057_v32 = vpop.eup %4056 }
0x1633   : > { %v2327_v33 = vadd.f32 1.0, %v4057_v32  ;;  %v2330_v34 = vmul.f32 -0.5, %v4057_v32  ;;  %v2333_v36 = vand.u32 2147483647, %v4057_v32 }
0x1635   : > { %4058 = vlog2.f32 %v2327_v33  ;;  %v2331_v35 = vadd.f32 1.0, %v2330_v34  ;;  %vm2334_vm8 = vcmp.lt.f32.partialorder %v2333_v36, 0.0004427343 }
0x1637   : > { %v2332_v39 = vmul.f32 %v4057_v32, %v2331_v35 }
0x1642   : > { %v4059_v37 = vpop.eup %4058 }
0x1643   : > { %v2329_v38 = vmul.f32 0.6931472, %v4059_v37 }
0x1645   : > { %v2335_v41 = vsel %vm2334_vm8, %v2332_v39, %v2329_v38 }
0x1646   : > { %v2337_v42 = vadd.f32 %v2336_v40, %v2335_v41 }
0x1648   : > { %2499 = vrot.lane.b32.xlu0 %v2337_v42, %s4110_s10  ;;  %3849 = vmatmul.mubr.msk.f32.vlgmr.msra.gmra.mxu1 %vm160_vm4, %v2337_v42 }
0x1649   : > { %3882 = vmatpush3.msk.msra.mxu1 %vm67_vm0, %v4151_v0  ;;  %3883 = vmatprep.mubr.msk.f32.mxu1 %vm4109_vm1, %v4108_v30 }
0x164a   : > { %3913 = vmatprep.subr.mxu1 %v4108_v30 }
0x16ba   : > { %v2500_v33 = vpop.permute.xlu0 %2499 }
0x1708   : > { %v2407_v43 = vpop.f32.mrf.mxu1 }
0x1709   : > { %v2408_v46 = vadd.f32 %v4216_v13, %v2407_v43 }
0x170a   : > { %v3850_v49 = vpop.f32.mrf.mxu1 }
0x170b   : > { %v2411_v50 = vand.u32 2147483647, %v2408_v46  ;;  %v2424_v63 = vmax.f32 %v2408_v46, 0.0 }
0x170d   : > { %v2412_v51 = vsub.f32 0.0, %v2411_v50 }
0x170f   : > { %v2413_v54 = vmul.f32 1.442695, %v2412_v51  ;;  %v3174_v51 = vld [vmem:[%s4423_s15 + $0x18] sm:$0xf] }
0x1711   : > { %4060 = vpow2.f32 %v2413_v54  ;;  %v3177_v54 = vld [vmem:[%s4429_s18 + $0x18] sm:$0xf] }
0x171e   : > { %v4061_v55 = vpop.eup %4060 }
0x171f   : > { %v2415_v56 = vadd.f32 1.0, %v4061_v55  ;;  %v2418_v57 = vmul.f32 -0.5, %v4061_v55  ;;  %v2421_v59 = vand.u32 2147483647, %v4061_v55 }
0x1721   : > { %4062 = vlog2.f32 %v2415_v56  ;;  %v2419_v58 = vadd.f32 1.0, %v2418_v57  ;;  %vm2422_vm0 = vcmp.lt.f32.partialorder %v2421_v59, 0.0004427343 }
0x1723   : > { %v2420_v62 = vmul.f32 %v4061_v55, %v2419_v58  ;;  %v2604_v58 = vmul.f32 0.1, %v3177_v54 }
0x172e   : > { %v4063_v60 = vpop.eup %4062 }
0x172f   : > { %v2417_v61 = vmul.f32 0.6931472, %v4063_v60 }
0x1731   : > { %v2423_v31 = vsel %vm2422_vm0, %v2420_v62, %v2417_v61 }
0x1732   : > { %v2425_v32 = vadd.f32 %v2424_v63, %v2423_v31 }
0x1734   : > { %3868 = vmatmul.mubr.msk.f32.vlgmr.msra.gmra.mxu0 %vm253_vm6, %v2425_v32 }
0x1735   : > { %3871 = vmatpush3.msra.mxu0 %v4281_v26  ;;  %3878 = vmatprep.mubr.msk.f32.mxu0 %vm4109_vm1, %v4108_v30 }
0x1736   : > { %3872 = vmatprep.subr.mxu0 %v4108_v30 }
0x1737   : > { %3873 = vmatpush3.msra.mxu0 %v4276_v25 }
0x1738   : > { %3874 = vmatprep.subr.mxu0 %v4108_v30 }
0x1739   : > { %3875 = vmatpush3.msra.mxu0 %v4271_v24 }
0x173a   : > { %3876 = vmatprep.subr.mxu0 %v4108_v30 }
0x173b   : > { %3877 = vmatpush3.msra.mxu0 %v4266_v23 }
0x173c   : > { %3879 = vmatmul.mubr.msk.f32.vlgmr.msra.gmra.mxu0 %vm333_vm7, %v2500_v33  ;;  %3886 = vmatprep.subr.mxu0 %v4108_v30 }
0x173d   : > { %3887 = vmatpush3.msra.mxu0 %v4211_v12  ;;  %3910 = vmatprep.mubr.msk.f32.mxu0 %vm4109_vm1, %v4108_v30 }
0x173e   : > { %3888 = vmatprep.subr.mxu0 %v4108_v30 }
0x173f   : > { %3889 = vmatpush3.msra.mxu0 %v4206_v11 }
0x1740   : > { %3890 = vmatprep.subr.mxu0 %v4108_v30 }
0x1741   : > { %3891 = vmatpush3.msra.mxu0 %v4201_v10 }
0x1742   : > { %3892 = vmatprep.subr.mxu0 %v4108_v30 }
0x1743   : > { %3893 = vmatpush3.msra.mxu0 %v4196_v9 }
0x1744   : > { %3894 = vmatprep.subr.mxu0 %v4108_v30 }
0x1745   : > { %3895 = vmatpush3.msra.mxu0 %v4191_v8 }
0x1746   : > { %3896 = vmatprep.subr.mxu0 %v4108_v30 }
0x1747   : > { %3897 = vmatpush3.msra.mxu0 %v4186_v7 }
0x1748   : > { %3898 = vmatprep.subr.mxu0 %v4108_v30 }
0x1749   : > { %3899 = vmatpush3.msra.mxu0 %v4181_v6 }
0x174a   : > { %3900 = vmatprep.subr.mxu0 %v4108_v30 }
0x174b   : > { %3901 = vmatpush3.msra.mxu0 %v4176_v5 }
0x174c   : > { %3902 = vmatprep.subr.mxu0 %v4108_v30 }
0x174d   : > { %3903 = vmatpush3.msra.mxu0 %v4171_v4 }
0x174e   : > { %3904 = vmatprep.subr.mxu0 %v4108_v30 }
0x174f   : > { %3905 = vmatpush3.msra.mxu0 %v4166_v3 }
0x1750   : > { %3906 = vmatprep.subr.mxu0 %v4108_v30 }
0x1751   : > { %3907 = vmatpush3.msra.mxu0 %v4161_v2 }
0x1752   : > { %3908 = vmatprep.subr.mxu0 %v4108_v30 }
0x1753   : > { %3909 = vmatpush3.msra.mxu0 %v4156_v1 }
0x17f4   : > { %v2495_v34 = vpop.f32.mrf.mxu0 }
0x17f5   : > { %v2496_v35 = vadd.f32 %v4261_v22, %v2495_v34 }
0x17f6   : > { %v3869_v36 = vpop.f32.mrf.mxu0 }
0x17f7   : > { %2582 = vrot.lane.b32.xlu1 %v2496_v35, %s4111_s11 }
0x17fc   : > { %v2569_v37 = vpop.f32.mrf.mxu0 }
0x17fd   : > { %v2570_v41 = vadd.f32 %v4286_v27, %v2569_v37 }
0x17fe   : > { %v3880_v38 = vpop.f32.mrf.mxu0 }
0x17ff   : > { %v2573_v42 = vsub.f32 0.0, %v2570_v41 }
0x1801   : > { %v2574_v43 = vmul.f32 1.442695, %v2573_v42 }
0x1803   : > { %4064 = vpow2.f32 %v2574_v43 }
0x1810   : > { %v4065_v46 = vpop.eup %4064 }
0x1811   : > { %v2576_v49 = vadd.f32 1.0, %v4065_v46 }
0x1813   : > { %4066 = vrcp.f32 %v2576_v49 }
0x1820   : > { %v4067_v50 = vpop.eup %4066 }
0x1821   : > { %4068 = vrcp.f32 %v4067_v50  ;;  %v2605_v63 = vmul.f32 %v4067_v50, %v2604_v58 }
0x182e   : > { %v4069_v57 = vpop.eup %4068 }
0x1869   : > { %v2583_v39 = vpop.permute.xlu1 %2582 }
0x186a   : > { %v2585_v40 = vsub.f32 %v2496_v35, %v2583_v39 }
0x186c   : > { %2587 = vrot.lane.b32.xlu0 %v2585_v40, %s4112_s12 }
0x18de   : > { %v2588_v55 = vpop.permute.xlu0 %2587 }
0x18df   : > { %v2590_v56 = vmul.f32 %v3174_v51, %v2588_v55  ;;  %v426_v55 = vmul.f32 %v4433_v53, %v4433_v53 }
0x18e1   : > { %v4900_v59 = vmul.f32 %v4069_v57, %v2590_v56  ;;  %v2599_v60 = vadd.f32 %v2590_v56, %v2496_v35  ;;  %v428_v56 = vsel %vm427_vm9, %v426_v55, 0.0  ;;  %v1510_v57 = vmul.f32 %v4667_v44, %v4667_v44 }
0x18e2   : > { %v788_v55 = vmul.f32 %v4511_v48, %v4511_v48 }
0x18e3   : > { %v2600_v61 = vmul.f32 0.01, %v2599_v60  ;;  %v1511_v58 = vsel %vm427_vm9, %v1510_v57, 0.0  ;;  %v2232_v60 = vmul.f32 %v4823_v52, %v4823_v52 }
0x18e5   : > { %v2601_v62 = vadd.f32 %v2600_v61, %v4826_v28  ;;  %v3180_v28 = vld [vmem:[%s4366_s9 + $0x1c] sm:$0xf]  ;;  %v2233_v61 = vsel %vm427_vm9, %v2232_v60, 0.0 }
0x18e7   : > { %v4903_v31 = vadd.f32 %v2605_v63, %v2601_v62 }
0x18e9   : > { %3884 = vmatmul.mubr.msk.f32.vlgmr.msra.gmra.mxu1 %vm63_vm2, %v4903_v31 }
0x18ea   : > { %3914 = vmatpush3.msra.mxu1 %v4256_v21  ;;  %3929 = vmatprep.mubr.msk.f32.mxu1 %vm4109_vm1, %v4108_v30 }
0x18eb   : > { %3915 = vmatprep.subr.mxu1 %v4108_v30 }
0x18ec   : > { %3916 = vmatpush3.msra.mxu1 %v4251_v20 }
0x18ed   : > { %3917 = vmatprep.subr.mxu1 %v4108_v30 }
0x18ee   : > { %3918 = vmatpush3.msra.mxu1 %v4246_v19 }
0x18ef   : > { %3919 = vmatprep.subr.mxu1 %v4108_v30 }
0x18f0   : > { %3920 = vmatpush3.msra.mxu1 %v4241_v18 }
0x18f1   : > { %3921 = vmatprep.subr.mxu1 %v4108_v30 }
0x18f2   : > { %3922 = vmatpush3.msra.mxu1 %v4236_v17 }
0x18f3   : > { %3923 = vmatprep.subr.mxu1 %v4108_v30 }
0x18f4   : > { %3924 = vmatpush3.msra.mxu1 %v4231_v16 }
0x18f5   : > { %3925 = vmatprep.subr.mxu1 %v4108_v30 }
0x18f6   : > { %3926 = vmatpush3.msra.mxu1 %v4226_v15 }
0x18f7   : > { %3927 = vmatprep.subr.mxu1 %v4108_v30 }
0x18f8   : > { %3928 = vmatpush3.msra.mxu1 %v4221_v14 }
0x18f9   : > { %3932 = vmatprep.subr.mxu1 %v4108_v30 }
0x19a9   : > { %v2680_v32 = vpop.f32.mrf.mxu1 }
0x19aa   : > { %v2681_v33 = vadd.f32 %v3180_v28, %v2680_v32 }
0x19ab   : > { %v3885_v34 = vpop.f32.mrf.mxu1 }
0x19ac   : > { %v2684_v35 = vand.u32 2147483647, %v2681_v33  ;;  %v2697_v50 = vmax.f32 %v2681_v33, 0.0 }
0x19ae   : > { %v2685_v36 = vsub.f32 0.0, %v2684_v35 }
0x19b0   : > { %v2686_v37 = vmul.f32 1.442695, %v2685_v36 }
0x19b2   : > { %4070 = vpow2.f32 %v2686_v37 }
0x19bf   : > { %v4071_v38 = vpop.eup %4070 }
0x19c0   : > { %v2688_v39 = vadd.f32 1.0, %v4071_v38  ;;  %v2691_v40 = vmul.f32 -0.5, %v4071_v38  ;;  %v2694_v42 = vand.u32 2147483647, %v4071_v38 }
0x19c2   : > { %4072 = vlog2.f32 %v2688_v39  ;;  %v2692_v41 = vadd.f32 1.0, %v2691_v40  ;;  %vm2695_vm2 = vcmp.lt.f32.partialorder %v2694_v42, 0.0004427343 }
0x19c4   : > { %v2693_v49 = vmul.f32 %v4071_v38, %v2692_v41 }
0x19cf   : > { %v4073_v43 = vpop.eup %4072 }
0x19d0   : > { %v2690_v46 = vmul.f32 0.6931472, %v4073_v43 }
0x19d2   : > { %v2696_v51 = vsel %vm2695_vm2, %v2693_v49, %v2690_v46 }
0x19d3   : > { %v2698_v54 = vadd.f32 %v2697_v50, %v2696_v51 }
0x19d5   : > { %2860 = vrot.lane.b32.xlu1 %v2698_v54, %s4110_s10  ;;  %3911 = vmatmul.mubr.msk.f32.vlgmr.msra.gmra.mxu0 %vm160_vm4, %v2698_v54 }
0x19f9   : > { %429 = vadd.xlane.f32.xlu1 %v428_v56  ;;  %v789_v56 = vsel %vm427_vm9, %v788_v55, 0.0 }
0x19fd   : > { %1512 = vadd.xlane.f32.xlu1 %v1511_v58  ;;  %v1871_v58 = vmul.f32 %v4745_v47, %v4745_v47 }
0x19ff   : > { %v1872_v60 = vsel %vm427_vm9, %v1871_v58, 0.0 }
0x1a01   : > { %2234 = vadd.xlane.f32.xlu1 %v2233_v61  ;;  %v2593_v61 = vmul.f32 %v4900_v59, %v4900_v59 }
0x1a03   : > { %v2594_v48 = vsel %vm427_vm9, %v2593_v61, 0.0 }
0x1a47   : > { %v2861_v43 = vpop.permute.xlu1 %2860 }
0x1a95   : > { %v2768_v62 = vpop.f32.mrf.mxu0 }
0x1a96   : > { %v2769_v63 = vadd.f32 %v4216_v13, %v2768_v62 }
0x1a97   : > { %v3912_v53 = vpop.f32.mrf.mxu0 }
0x1a98   : > { %v2772_v28 = vand.u32 2147483647, %v2769_v63  ;;  %v2785_v40 = vmax.f32 %v2769_v63, 0.0 }
0x1a9a   : > { %v2773_v32 = vsub.f32 0.0, %v2772_v28 }
0x1a9c   : > { %v2774_v33 = vmul.f32 1.442695, %v2773_v32 }
0x1a9e   : > { %4074 = vpow2.f32 %v2774_v33 }
0x1aab   : > { %v4075_v34 = vpop.eup %4074 }
0x1aac   : > { %v2776_v44 = vadd.f32 1.0, %v4075_v34  ;;  %v2779_v35 = vmul.f32 -0.5, %v4075_v34  ;;  %v2782_v37 = vand.u32 2147483647, %v4075_v34 }
0x1aae   : > { %4076 = vlog2.f32 %v2776_v44  ;;  %v2780_v36 = vadd.f32 1.0, %v2779_v35  ;;  %vm2783_vm4 = vcmp.lt.f32.partialorder %v2782_v37, 0.0004427343 }
0x1ab0   : > { %v2781_v39 = vmul.f32 %v4075_v34, %v2780_v36 }
0x1abb   : > { %v4077_v38 = vpop.eup %4076 }
0x1abc   : > { %v2778_v52 = vmul.f32 0.6931472, %v4077_v38 }
0x1abe   : > { %v2784_v41 = vsel %vm2783_vm4, %v2781_v39, %v2778_v52 }
0x1abf   : > { %v2786_v42 = vadd.f32 %v2785_v40, %v2784_v41 }
0x1ac1   : > { %3930 = vmatmul.mubr.msk.f32.vlgmr.msra.gmra.mxu1 %vm253_vm6, %v2786_v42 }
0x1ac2   : > { %3933 = vmatpush3.msra.mxu1 %v4281_v26  ;;  %3940 = vmatprep.mubr.msk.f32.mxu1 %vm4109_vm1, %v4108_v30  ;;  %vm2971_vm1 = vcmask (%p53_p0), 3072  }
0x1ac3   : > { %3934 = vmatprep.subr.mxu1 %v4108_v30 }
0x1ac4   : > { %3935 = vmatpush3.msra.mxu1 %v4276_v25 }
0x1ac5   : > { %3936 = vmatprep.subr.mxu1 %v4108_v30 }
0x1ac6   : > { %3937 = vmatpush3.msra.mxu1 %v4271_v24 }
0x1ac7   : > { %3938 = vmatprep.subr.mxu1 %v4108_v30  ;;  %v1149_v30 = vmul.f32 %v4589_v45, %v4589_v45  ;;  %v430_v45 = vpop.xlane.xlu1 %429 }
0x1ac8   : > { %3939 = vmatpush3.msra.mxu1 %v4266_v23  ;;  %v431_v53 = vmul.f32 0.005, %v430_v45 }
0x1ac9   : > { %3941 = vmatmul.mubr.msk.f32.vlgmr.msra.gmra.mxu1 %vm333_vm7, %v2861_v43  ;;  %v1150_v57 = vsel %vm427_vm9, %v1149_v30, 0.0  ;;  %v3188_v43 = vld [vmem:[%s4423_s15 + $0x1c] sm:$0xf] }
0x1aca   : > { %v432_v47 = vadd.f32 %v4098_v29, %v431_v53 }
0x1acb   : > { %v1513_v33 = vpop.xlane.xlu1 %1512 }
0x1acc   : > { %v1514_v36 = vmul.f32 0.005, %v1513_v33 }
0x1acf   : > { %v2235_v29 = vpop.xlane.xlu1 %2234 }
0x1ad0   : > { %v2236_v53 = vmul.f32 0.005, %v2235_v29 }
0x1b81   : > { %v2856_v46 = vpop.f32.mrf.mxu1 }
0x1b82   : > { %v2857_v49 = vadd.f32 %v4261_v22, %v2856_v46  ;;  %v3191_v46 = vld [vmem:[%s4429_s18 + $0x1c] sm:$0xf] }
0x1b83   : > { %v3931_v50 = vpop.f32.mrf.mxu1  ;;  %v2965_v55 = vmul.f32 0.1, %v3191_v46 }
0x1b84   : > { %2943 = vrot.lane.b32.xlu0 %v2857_v49, %s4111_s11 }
0x1b89   : > { %v2930_v51 = vpop.f32.mrf.mxu1 }
0x1b8a   : > { %v2931_v34 = vadd.f32 %v4286_v27, %v2930_v51 }
0x1b8b   : > { %v3942_v54 = vpop.f32.mrf.mxu1 }
0x1b8c   : > { %v2934_v38 = vsub.f32 0.0, %v2931_v34 }
0x1b8e   : > { %v2935_v39 = vmul.f32 1.442695, %v2934_v38 }
0x1b90   : > { %4078 = vpow2.f32 %v2935_v39 }
0x1b9d   : > { %v4079_v40 = vpop.eup %4078 }
0x1b9e   : > { %v2937_v41 = vadd.f32 1.0, %v4079_v40 }
0x1ba0   : > { %4080 = vrcp.f32 %v2937_v41 }
0x1ba3   : > { %790 = vadd.xlane.f32.xlu0 %v789_v56 }
0x1ba7   : > { %1151 = vadd.xlane.f32.xlu0 %v1150_v57 }
0x1bab   : > { %1873 = vadd.xlane.f32.xlu0 %v1872_v60 }
0x1bad   : > { %v4081_v42 = vpop.eup %4080 }
0x1bae   : > { %4082 = vrcp.f32 %v4081_v42  ;;  %v2966_v61 = vmul.f32 %v4081_v42, %v2965_v55 }
0x1baf   : > { %2595 = vadd.xlane.f32.xlu0 %v2594_v48 }
0x1bbb   : > { %v4083_v54 = vpop.eup %4082 }
0x1bf6   : > { %v2944_v62 = vpop.permute.xlu0 %2943 }
0x1bf7   : > { %v2946_v63 = vsub.f32 %v2857_v49, %v2944_v62 }
0x1bf9   : > { %2948 = vrot.lane.b32.xlu1 %v2946_v63, %s4112_s12 }
0x1c2c   : > { %v791_v28 = vpop.xlane.xlu0 %790 }
0x1c2d   : > { %v792_v32 = vmul.f32 0.005, %v791_v28 }
0x1c2f   : > { %v793_v59 = vadd.f32 %v792_v32, %v432_v47 }
0x1c30   : > { %v1152_v44 = vpop.xlane.xlu0 %1151 }
0x1c31   : > { %v1153_v35 = vmul.f32 0.005, %v1152_v44 }
0x1c33   : > { %v1154_v37 = vadd.f32 %v1153_v35, %v793_v59 }
0x1c34   : > { %v1874_v62 = vpop.xlane.xlu0 %1873 }
0x1c35   : > { %v1515_v52 = vadd.f32 %v1514_v36, %v1154_v37  ;;  %v1875_v63 = vmul.f32 0.005, %v1874_v62 }
0x1c37   : > { %v1876_v45 = vadd.f32 %v1875_v63, %v1515_v52 }
0x1c39   : > { %v2237_v32 = vadd.f32 %v2236_v53, %v1876_v45 }
0x1c6b   : > { %v2949_v50 = vpop.permute.xlu1 %2948 }
0x1c6c   : > { %v2951_v51 = vmul.f32 %v3188_v43, %v2949_v50 }
0x1c6e   : > { %v2953_v56 = vmul.f32 %v4083_v54, %v2951_v51  ;;  %v2960_v30 = vadd.f32 %v2951_v51, %v2857_v49  ;;  %v2596_v49 = vpop.xlane.xlu0 %2595 }
0x1c6f   : > { %v2597_v47 = vmul.f32 0.005, %v2596_v49 }
0x1c70   : > { %v2961_v57 = vmul.f32 0.01, %v2960_v30  ;;  %v2954_v58 = vmul.f32 %v2953_v56, %v2953_v56 }
0x1c72   : > { %v2962_v60 = vadd.f32 %v2961_v57, %v4903_v31  ;;  %v2955_v48 = vsel %vm427_vm9, %v2954_v58, 0.0  ;;  %v2598_v31 = vadd.f32 %v2597_v47, %v2237_v32 }
0x1c73   : > { %2956 = vadd.xlane.f32.xlu0 %v2955_v48 }
0x1c74   : > { %v2967_v28 = vadd.f32 %v2966_v61, %v2962_v60  }
0x1c76   : > { %2970 = vst.msk [vmem:[%s2969_s22] sm:$0xf] %vm427_vm9, %v2967_v28 }
0x1cfc   : > { %v2957_v33 = vpop.xlane.xlu0 %2956 }
0x1cfd   : > { %v2958_v34 = vmul.f32 0.005, %v2957_v33  ;;  %55 = sbr.rel (!%p53_p0) target bundleno = 11 (0xb), region = 80 }
0x1cff   : > { %v2959_v44 = vadd.f32 %v2958_v34, %v2598_v31  }
0x1d01   : > { %v4992_v29 = vmov %v2959_v44  ;;  %2972 = vst.msk [vmem:[%s4990_s6] sm:$0xf] (%p53_p0), %vm2971_vm1, %v2959_v44 }

</bundles_post_ra>
